<compile_context>
chip_gen: v5e
topology: v5e:2x2
jax: 0.10.0
libtpu: 0.0.40
codegen_flags: <defaults>
</compile_context>

<pallas_src>
import functools

import jax
import jax.numpy as jnp
from jax.experimental import pallas as pl
from jax.experimental.pallas import tpu as pltpu


def _round_up(x, m):
    return ((x + m - 1) // m) * m


def _theta_kernel(h_ref, wf_ref, mask_ref, out_ref):
    """Fused Theta forward for one batch tile.

    h_ref    : (tb, C*T)   activations, flattened over (component, time)
    wf_ref   : (C*T, NCP)  fused weight  W[c*T+t, n] = w_att[t] * w_cls[n, c] (class-padded)
    mask_ref : (1, NCP)    additive mask row: 0 on real classes, -inf on padded lanes
    out_ref  : (tb, NCP)   softmax output (padded lanes hold zeros)
    """
    # hard_att + classifier collapsed into a single MXU matmul (K = C*T).
    logits = jnp.dot(h_ref[...], wf_ref[...], preferred_element_type=jnp.float32)
    logits = logits + mask_ref[...]                      # kill padded class lanes (-inf)

    # Numerically-stable softmax over the class axis, f32 throughout.
    m = jnp.max(logits, axis=-1, keepdims=True)
    e = jnp.exp(logits - m)
    denom = jnp.sum(e, axis=-1, keepdims=True)
    out_ref[...] = (e * pl.reciprocal(denom, approx=True)).astype(out_ref.dtype)


def _pick_batch_tile(B, K, h_itemsize, w_itemsize, ncp):
    """Pick a batch tile and an explicit scoped-VMEM limit.

    Footprint accounting uses the real (8,128)-padded shapes and counts 2 pipeline
    buffers per operand.  Tile is capped at 512 rows (bigger tiles buy nothing past
    ~85% of HBM roofline) and, for large B, at B//4 so there are >= 4 grid steps
    (DMA/compute overlap + both TensorCores on v7x).
    """
    k_lane = _round_up(K, 128)                              # lane padding of H tile rows
    k_sub = _round_up(K, 8)                                 # sublane padding of fused weight
    resident = 2 * k_sub * ncp * w_itemsize + 2 * 8 * ncp * 4   # fused W + mask (2 bufs each)
    per_row = 2 * k_lane * h_itemsize + 2 * ncp * 4         # H tile + f32 out tile, 2 bufs

    stream_budget = max((28 << 20) - resident, 1 << 20)
    tb = max(8, stream_budget // per_row)
    tb = min(tb, 512)
    if B > 64:
        tb = min(tb, max(8, ((B // 4) // 8) * 8))           # guarantee >= 4 grid steps
    tb = max(8, (tb // 8) * 8)                              # sublane-aligned tile
    if tb >= B:
        tb = B

    total = _round_up(tb, 8) * per_row + resident
    vmem_limit = int(min(max(total + (2 << 20), 16 << 20), 48 << 20))
    return int(tb), vmem_limit


def prepare_theta_params(w_att, w_cls, param_dtype=jnp.float32):
    """One-time parameter prep (do at model init, not per forward call).

    Folds hard_att into the classifier:  W_fused[c*T + t, n] = w_att[t] * w_cls[n, c]
    and zero-pads the class axis to a multiple of 128.

    w_att : (1, T)                torch hard_att.weight
    w_cls : (num_classes, n_comp) torch classifier[0].weight
    Returns:
      w_fused  : (n_comp*T, NCP) in param_dtype (use bf16 to halve resident VMEM / HBM)
      cls_mask : (1, NCP) f32 additive mask (0 on real classes, -inf on padding)
    """
    T = w_att.shape[-1]
    num_classes, n_comp = w_cls.shape
    ncp = _round_up(num_classes, 128)

    w_att_f = jnp.asarray(w_att, jnp.float32).reshape(T)            # (T,)
    w_cls_f = jnp.asarray(w_cls, jnp.float32)                       # (num_classes, n_comp)
    fused = w_cls_f.T[:, None, :] * w_att_f[None, :, None]          # (n_comp, T, num_classes)
    fused = fused.reshape(n_comp * T, num_classes)
    w_fused = jnp.zeros((n_comp * T, ncp), jnp.float32).at[:, :num_classes].set(fused)
    cls_mask = jnp.full((1, ncp), -jnp.inf, jnp.float32).at[:, :num_classes].set(0.0)
    return w_fused.astype(param_dtype), cls_mask


@functools.partial(jax.jit, static_argnames=("num_classes",))
def theta_forward(H, w_fused, cls_mask, *, num_classes):
    """H: (B, n_comp, T), f32 or bf16 (bf16 halves HBM traffic; MXU-native).
    w_fused / cls_mask come from prepare_theta_params."""
    B, C, T = H.shape
    K = C * T
    ncp = w_fused.shape[-1]
    assert w_fused.shape[0] == K

    H2 = H.reshape(B, K)                                   # contiguous -> free
    tb, vmem_limit = _pick_batch_tile(
        B, K, jnp.dtype(H.dtype).itemsize, jnp.dtype(w_fused.dtype).itemsize, ncp)
    grid = (pl.cdiv(B, tb),)

    out_padded = pl.pallas_call(
        _theta_kernel,
        out_shape=jax.ShapeDtypeStruct((B, ncp), jnp.float32),
        grid=grid,
        in_specs=[
            pl.BlockSpec((tb, K), lambda i: (i, 0)),       # batch-tiled activations
            pl.BlockSpec((K, ncp), lambda i: (0, 0)),      # resident fused weight
            pl.BlockSpec((1, ncp), lambda i: (0, 0)),      # resident class mask
        ],
        out_specs=pl.BlockSpec((tb, ncp), lambda i: (i, 0)),   # lane-dense (128-mult) store
        compiler_params=pltpu.CompilerParams(
            dimension_semantics=("parallel",),             # shard batch grid across v7x TCs
            vmem_limit_bytes=vmem_limit,
        ),
    )(H2, w_fused, cls_mask)

    return out_padded[:, :num_classes]


if __name__ == "__main__":
    # Shapes from the module's docstring example (plus batch=2).
    B, n_comp, T, num_classes = 2, 30, 120, 50

    key = jax.random.PRNGKey(0)
    k_h, k_att, k_cls = jax.random.split(key, 3)

    H = jax.random.uniform(k_h, (B, n_comp, T), dtype=jnp.float32)
    att_bound = 1.0 / (T ** 0.5)
    cls_bound = 1.0 / (n_comp ** 0.5)
    w_att = jax.random.uniform(k_att, (1, T), jnp.float32, -att_bound, att_bound)
    w_cls = jax.random.uniform(k_cls, (num_classes, n_comp), jnp.float32,
                               -cls_bound, cls_bound)

    # One-time parameter prep (hard_att folded into classifier + class padding).
    w_fused, cls_mask = prepare_theta_params(w_att, w_cls)
    out = theta_forward(H, w_fused, cls_mask, num_classes=num_classes)
    out = jax.block_until_ready(out)

    # Reference in plain JAX (same math as the PyTorch module).
    z_ref = jnp.einsum("bct,t->bc", H, w_att[0])
    logits_ref = z_ref @ w_cls.T
    ref = jax.nn.softmax(logits_ref, axis=1)

    assert out.shape == (B, num_classes)
    assert jnp.allclose(out, ref, atol=2e-3, rtol=2e-3), float(jnp.max(jnp.abs(out - ref)))
    assert jnp.allclose(jnp.sum(out, axis=1), 1.0, atol=1e-2)

    print("KERNEL_OK")
</pallas_src>

<mosaic_0001>
module attributes {stable_mosaic.version = 11 : i64} {
  func.func @_theta_kernel(%arg0: i32, %arg1: memref<2x3600xf32, #tpu.memory_space<vmem>>, %arg2: memref<3600x128xf32, #tpu.memory_space<vmem>>, %arg3: memref<1x128xf32, #tpu.memory_space<vmem>>, %arg4: memref<2x128xf32, #tpu.memory_space<vmem>>) attributes {dimension_semantics = [#tpu.dimension_semantics<parallel>], iteration_bounds = array<i64: 1>, scalar_prefetch = 0 : i64, scratch_operands = 0 : i64, tpu.core_type = #tpu.core_type<tc>, window_params = [{transform_indices = @transform_0, window_bounds = array<i64: 2, 3600>}, {pipeline_mode = #tpu.pipeline_mode<synchronous>, transform_indices = @transform_1, window_bounds = array<i64: 3600, 128>}, {pipeline_mode = #tpu.pipeline_mode<synchronous>, transform_indices = @transform_2, window_bounds = array<i64: 1, 128>}, {transform_indices = @transform_3, window_bounds = array<i64: 2, 128>}]} {
    %c0 = arith.constant 0 : index
    %c0_0 = arith.constant 0 : index
    %0 = vector.load %arg1[%c0, %c0_0] : memref<2x3600xf32, #tpu.memory_space<vmem>>, vector<2x3600xf32>
    %c0_1 = arith.constant 0 : index
    %c0_2 = arith.constant 0 : index
    %1 = vector.load %arg2[%c0_1, %c0_2] : memref<3600x128xf32, #tpu.memory_space<vmem>>, vector<3600x128xf32>
    %cst = arith.constant dense<0.000000e+00> : vector<2x128xf32>
    %2 = tpu.matmul %0, %1, %cst {dimension_numbers = #tpu.dot_dimension_numbers<[1], [0], [0], [1], [0, 0, 1, 1], [], []>} : vector<2x3600xf32>, vector<3600x128xf32>, vector<2x128xf32> -> vector<2x128xf32>
    %c0_3 = arith.constant 0 : index
    %c0_4 = arith.constant 0 : index
    %3 = vector.load %arg3[%c0_3, %c0_4] : memref<1x128xf32, #tpu.memory_space<vmem>>, vector<1x128xf32>
    %4 = vector.broadcast %3 : vector<1x128xf32> to vector<2x128xf32>
    %5 = arith.addf %2, %4 : vector<2x128xf32>
    %cst_5 = arith.constant dense<0xFF800000> : vector<2xf32>
    %6 = vector.multi_reduction <maximumf>, %5, %cst_5 [1] : vector<2x128xf32> to vector<2xf32>
    %7 = vector.shape_cast %6 : vector<2xf32> to vector<2x1xf32>
    %8 = vector.broadcast %7 : vector<2x1xf32> to vector<2x128xf32>
    %9 = arith.subf %5, %8 : vector<2x128xf32>
    %10 = math.exp %9 : vector<2x128xf32>
    %cst_6 = arith.constant dense<0.000000e+00> : vector<2xf32>
    %11 = vector.multi_reduction <add>, %10, %cst_6 [1] : vector<2x128xf32> to vector<2xf32>
    %12 = vector.shape_cast %11 : vector<2xf32> to vector<2x1xf32>
    %13 = tpu.reciprocal %12 {approx = true} : vector<2x1xf32> -> vector<2x1xf32>
    %14 = vector.broadcast %13 : vector<2x1xf32> to vector<2x128xf32>
    %15 = arith.mulf %10, %14 : vector<2x128xf32>
    %c0_7 = arith.constant 0 : index
    %c0_8 = arith.constant 0 : index
    %16 = vector.load %arg4[%c0_7, %c0_8] : memref<2x128xf32, #tpu.memory_space<vmem>>, vector<2x128xf32>
    tpu.vector_store %arg4[%c0_7, %c0_8], %15 {strides = array<i32>} : memref<2x128xf32, #tpu.memory_space<vmem>>, vector<2x128xf32>,
    return
  }
  func.func @transform_0(%arg0: i32) -> (i32, i32) {
    %c0_i32 = arith.constant 0 : i32
    %c0_i32_0 = arith.constant 0 : i32
    return %arg0, %c0_i32 : i32, i32
  }
  func.func @transform_1(%arg0: i32) -> (i32, i32) {
    %c0_i32 = arith.constant 0 : i32
    %c0_i32_0 = arith.constant 0 : i32
    %c0_i32_1 = arith.constant 0 : i32
    return %c0_i32, %c0_i32_0 : i32, i32
  }
  func.func @transform_2(%arg0: i32) -> (i32, i32) {
    %c0_i32 = arith.constant 0 : i32
    %c0_i32_0 = arith.constant 0 : i32
    %c0_i32_1 = arith.constant 0 : i32
    return %c0_i32, %c0_i32_0 : i32, i32
  }
  func.func @transform_3(%arg0: i32) -> (i32, i32) {
    %c0_i32 = arith.constant 0 : i32
    %c0_i32_0 = arith.constant 0 : i32
    return %arg0, %c0_i32 : i32, i32
  }
}

</mosaic_0001>

<bundles_post_ra>
// kernel: theta_forward.1
= control target key start
LH: loop header
LB: loop body
LE: loop exit
PB: predicated region body
PF: predicated region fallthrough
CT: control target
= control target key end

     0   :  { %8 = vsyncpa [#allocation3], 0  ;;  %s1384_s0 = inlined_call_operand.vmem [shape: f32[2,3600], index: 0, kind: input, shape index: {}]   ;;  %s1385_s1 = inlined_call_operand.hbm [shape: f32[3600,128], index: 1, kind: input, shape index: {}]   ;;  %s1386_s2 = inlined_call_operand.hbm [shape: f32[1,128], index: 2, kind: input, shape index: {}]   ;;  %s1387_s3 = inlined_call_operand.hbm [shape: f32[2,128], index: 3, kind: output, shape index: {}]  }
   0x1   :  { %9 = vsyncpa [#allocation6], 0 }
   0x2   :  { %10 = vsyncpa [#allocation4], 0  ;;  %s17_s14 = sshll.u32 %s1385_s1, 4  ;;  %s1284_s15 = smov [#allocation2]   ;;  %s18_s14 = int_to_ptr.hbm [resolvable:$true] %s17_s14 }
   0x3   :  { %s19_s16 = sshll.u32 %s1284_s15, 4  ;;  %s31_s19 = sshll.u32 %s1386_s2, 4  ;;  %s20_s16 = int_to_ptr.vmem [resolvable:$true] %s19_s16  ;;  %s32_s19 = int_to_ptr.hbm [resolvable:$true] %s31_s19 }
   0x4   :  { %s1285_s20 = smov 128   ;;  %s1286_s21 = smov 8  }
   0x5   :  { %25 = dma.hbm_to_vmem [thread:$0]  %s18_s14, 57600, %s20_s16, [#allocation3], %s1285_s20, %s1285_s20, %s1286_s21  }
   0x6   :  { %s1287_s22 = smov [#allocation5]  }
   0x7   :  { %s33_s23 = sshll.u32 %s1287_s22, 4  ;;  %s34_s23 = int_to_ptr.vmem [resolvable:$true] %s33_s23 }
   0x8   :  { %36 = dma.hbm_to_vmem [thread:$0]  %s32_s19, 16, %s34_s23, [#allocation6]  }
   0x9   :  { %1278 = dma.done.wait [#allocation3], 57600  }
   0xa   :  { %1279 = vsyncadd [#allocation3], 4294909696 }
   0xb   :  { %1280 = dma.done.wait [#allocation6], 16  }
   0xc   :  { %1281 = vsyncadd [#allocation6], 4294967280  ;;  %v68_v0 = vld [vmem:[#allocation2 + $0x78] sm:$0xff]  ;;  %v67_v2 = vld [vmem:[#allocation2 + $0x70] sm:$0xff]  ;;  %vm581_vm0 = vcmask 130048   ;;  %vm1164_vm1 = vcmask 1041408  }
   0xd   :  { %v100_v1 = vld [vmem:[#allocation2 + $0x178] sm:$0xff]  ;;  %584 = vmatpush.msra.mxu0 %v68_v0  ;;  %v99_v4 = vld [vmem:[#allocation2 + $0x170] sm:$0xff]  ;;  %v66_v6 = vld [vmem:[#allocation2 + $0x68] sm:$0xff]  ;;  %s1184_s14 = sshll.u32 %s1387_s3, 4  ;;  %s1185_s14 = int_to_ptr.hbm [resolvable:$true] %s1184_s14 }
   0xe   :  { %624 = vmatpush.msra.mxu2 %v100_v1  ;;  %v84_v3 = vld [vmem:[#allocation2 + $0xf8] sm:$0xff]  ;;  %v83_v7 = vld [vmem:[#allocation2 + $0xf0] sm:$0xff]  ;;  %v98_v8 = vld [vmem:[#allocation2 + $0x168] sm:$0xff] }
   0xf   :  { %v116_v5 = vld [vmem:[#allocation2 + $0x1f8] sm:$0xff]  ;;  %604 = vmatpush.msra.mxu1 %v84_v3  ;;  %585 = vmatpush.msra.mxu0 %v67_v2  ;;  %v115_v9 = vld [vmem:[#allocation2 + $0x1f0] sm:$0xff]  ;;  %v82_v10 = vld [vmem:[#allocation2 + $0xe8] sm:$0xff] }
  0x10   :  { %644 = vmatpush.msra.mxu3 %v116_v5  ;;  %625 = vmatpush.msra.mxu2 %v99_v4  ;;  %v65_v11 = vld [vmem:[#allocation2 + $0x60] sm:$0xff]  ;;  %v114_v13 = vld [vmem:[#allocation2 + $0x1e8] sm:$0xff]  ;;  %v64_v16 = vld [vmem:[#allocation2 + $0x58] sm:$0xff] }
  0x11   :  { %605 = vmatpush.msra.mxu1 %v83_v7  ;;  %v97_v12 = vld [vmem:[#allocation2 + $0x160] sm:$0xff]  ;;  %586 = vmatpush.msra.mxu0 %v66_v6  ;;  %v96_v17 = vld [vmem:[#allocation2 + $0x158] sm:$0xff]  ;;  %v63_v20 = vld [vmem:[#allocation2 + $0x50] sm:$0xff] }
  0x12   :  { %645 = vmatpush.msra.mxu3 %v115_v9  ;;  %626 = vmatpush.msra.mxu2 %v98_v8  ;;  %v81_v14 = vld [vmem:[#allocation2 + $0xe0] sm:$0xff]  ;;  %v80_v18 = vld [vmem:[#allocation2 + $0xd8] sm:$0xff]  ;;  %v95_v21 = vld [vmem:[#allocation2 + $0x150] sm:$0xff] }
  0x13   :  { %v113_v15 = vld [vmem:[#allocation2 + $0x1e0] sm:$0xff]  ;;  %606 = vmatpush.msra.mxu1 %v82_v10  ;;  %587 = vmatpush.msra.mxu0 %v65_v11  ;;  %v112_v19 = vld [vmem:[#allocation2 + $0x1d8] sm:$0xff]  ;;  %v79_v22 = vld [vmem:[#allocation2 + $0xd0] sm:$0xff] }
  0x14   :  { %646 = vmatpush.msra.mxu3 %v114_v13  ;;  %627 = vmatpush.msra.mxu2 %v97_v12  ;;  %v111_v23 = vld [vmem:[#allocation2 + $0x1d0] sm:$0xff]  ;;  %v62_v24 = vld [vmem:[#allocation2 + $0x48] sm:$0xff]  ;;  %v61_v28 = vld [vmem:[#allocation2 + $0x40] sm:$0xff] }
  0x15   :  { %607 = vmatpush.msra.mxu1 %v81_v14  ;;  %588 = vmatpush.msra.mxu0 %v64_v16  ;;  %v94_v25 = vld [vmem:[#allocation2 + $0x148] sm:$0xff]  ;;  %v93_v29 = vld [vmem:[#allocation2 + $0x140] sm:$0xff]  ;;  %v60_v32 = vld [vmem:[#allocation2 + $0x38] sm:$0xff] }
  0x16   :  { %647 = vmatpush.msra.mxu3 %v113_v15  ;;  %628 = vmatpush.msra.mxu2 %v96_v17  ;;  %v78_v26 = vld [vmem:[#allocation2 + $0xc8] sm:$0xff]  ;;  %v77_v30 = vld [vmem:[#allocation2 + $0xc0] sm:$0xff]  ;;  %v92_v33 = vld [vmem:[#allocation2 + $0x138] sm:$0xff] }
  0x17   :  { %608 = vmatpush.msra.mxu1 %v80_v18  ;;  %589 = vmatpush.msra.mxu0 %v63_v20  ;;  %v110_v27 = vld [vmem:[#allocation2 + $0x1c8] sm:$0xff]  ;;  %v109_v31 = vld [vmem:[#allocation2 + $0x1c0] sm:$0xff]  ;;  %v76_v34 = vld [vmem:[#allocation2 + $0xb8] sm:$0xff] }
  0x18   :  { %648 = vmatpush.msra.mxu3 %v112_v19  ;;  %629 = vmatpush.msra.mxu2 %v95_v21  ;;  %v108_v35 = vld [vmem:[#allocation2 + $0x1b8] sm:$0xff]  ;;  %v59_v36 = vld [vmem:[#allocation2 + $0x30] sm:$0xff]  ;;  %v58_v40 = vld [vmem:[#allocation2 + $0x28] sm:$0xff] }
  0x19   :  { %609 = vmatpush.msra.mxu1 %v79_v22  ;;  %590 = vmatpush.msra.mxu0 %v62_v24  ;;  %v91_v37 = vld [vmem:[#allocation2 + $0x130] sm:$0xff]  ;;  %v90_v41 = vld [vmem:[#allocation2 + $0x128] sm:$0xff]  ;;  %v57_v44 = vld [vmem:[#allocation2 + $0x20] sm:$0xff] }
  0x1a   :  { %649 = vmatpush.msra.mxu3 %v111_v23  ;;  %630 = vmatpush.msra.mxu2 %v94_v25  ;;  %v75_v38 = vld [vmem:[#allocation2 + $0xb0] sm:$0xff]  ;;  %v74_v42 = vld [vmem:[#allocation2 + $0xa8] sm:$0xff]  ;;  %v89_v45 = vld [vmem:[#allocation2 + $0x120] sm:$0xff] }
  0x1b   :  { %610 = vmatpush.msra.mxu1 %v78_v26  ;;  %591 = vmatpush.msra.mxu0 %v61_v28  ;;  %v107_v39 = vld [vmem:[#allocation2 + $0x1b0] sm:$0xff]  ;;  %v106_v43 = vld [vmem:[#allocation2 + $0x1a8] sm:$0xff]  ;;  %v73_v46 = vld [vmem:[#allocation2 + $0xa0] sm:$0xff] }
  0x1c   :  { %650 = vmatpush.msra.mxu3 %v110_v27  ;;  %631 = vmatpush.msra.mxu2 %v93_v29  ;;  %v105_v47 = vld [vmem:[#allocation2 + $0x1a0] sm:$0xff]  ;;  %v56_v48 = vld [vmem:[#allocation2 + $0x18] sm:$0xff]  ;;  %v55_v52 = vld [vmem:[#allocation2 + $0x10] sm:$0xff] }
  0x1d   :  { %611 = vmatpush.msra.mxu1 %v77_v30  ;;  %592 = vmatpush.msra.mxu0 %v60_v32  ;;  %v88_v49 = vld [vmem:[#allocation2 + $0x118] sm:$0xff]  ;;  %v87_v53 = vld [vmem:[#allocation2 + $0x110] sm:$0xff]  ;;  %v54_v56 = vld [vmem:[#allocation2 + $0x8] sm:$0xff] }
  0x1e   :  { %651 = vmatpush.msra.mxu3 %v109_v31  ;;  %632 = vmatpush.msra.mxu2 %v92_v33  ;;  %v72_v50 = vld [vmem:[#allocation2 + $0x98] sm:$0xff]  ;;  %v71_v54 = vld [vmem:[#allocation2 + $0x90] sm:$0xff]  ;;  %v86_v57 = vld [vmem:[#allocation2 + $0x108] sm:$0xff] }
  0x1f   :  { %612 = vmatpush.msra.mxu1 %v76_v34  ;;  %593 = vmatpush.msra.mxu0 %v59_v36  ;;  %v104_v51 = vld [vmem:[#allocation2 + $0x198] sm:$0xff]  ;;  %v103_v55 = vld [vmem:[#allocation2 + $0x190] sm:$0xff]  ;;  %v70_v58 = vld [vmem:[#allocation2 + $0x88] sm:$0xff] }
  0x20   :  { %652 = vmatpush.msra.mxu3 %v108_v35  ;;  %633 = vmatpush.msra.mxu2 %v91_v37  ;;  %v102_v59 = vld [vmem:[#allocation2 + $0x188] sm:$0xff]  ;;  %v53_v60 = vld [vmem:[#allocation2] sm:$0xff]  ;;  %v132_v62 = vld [vmem:[#allocation2 + $0x278] sm:$0xff] }
  0x21   :  { %613 = vmatpush.msra.mxu1 %v75_v38  ;;  %594 = vmatpush.msra.mxu0 %v58_v40  ;;  %v85_v61 = vld [vmem:[#allocation2 + $0x100] sm:$0xff]  ;;  %v164_v63 = vld [vmem:[#allocation2 + $0x378] sm:$0xff]  ;;  %v131_v2 = vld [vmem:[#allocation2 + $0x270] sm:$0xff] }
  0x22   :  { %653 = vmatpush.msra.mxu3 %v107_v39  ;;  %634 = vmatpush.msra.mxu2 %v90_v41  ;;  %v69_v0 = vld [vmem:[#allocation2 + $0x80] sm:$0xff]  ;;  %v148_v3 = vld [vmem:[#allocation2 + $0x2f8] sm:$0xff]  ;;  %v163_v4 = vld [vmem:[#allocation2 + $0x370] sm:$0xff] }
  0x23   :  { %614 = vmatpush.msra.mxu1 %v74_v42  ;;  %595 = vmatpush.msra.mxu0 %v57_v44  ;;  %v101_v1 = vld [vmem:[#allocation2 + $0x180] sm:$0xff]  ;;  %v180_v5 = vld [vmem:[#allocation2 + $0x3f8] sm:$0xff]  ;;  %v130_v6 = vld [vmem:[#allocation2 + $0x268] sm:$0xff] }
  0x24   :  { %654 = vmatpush.msra.mxu3 %v106_v43  ;;  %635 = vmatpush.msra.mxu2 %v89_v45  ;;  %v147_v7 = vld [vmem:[#allocation2 + $0x2f0] sm:$0xff]  ;;  %v162_v8 = vld [vmem:[#allocation2 + $0x368] sm:$0xff]  ;;  %v129_v10 = vld [vmem:[#allocation2 + $0x260] sm:$0xff] }
  0x25   :  { %615 = vmatpush.msra.mxu1 %v73_v46  ;;  %596 = vmatpush.msra.mxu0 %v56_v48  ;;  %v179_v9 = vld [vmem:[#allocation2 + $0x3f0] sm:$0xff]  ;;  %v146_v11 = vld [vmem:[#allocation2 + $0x2e8] sm:$0xff]  ;;  %v161_v12 = vld [vmem:[#allocation2 + $0x360] sm:$0xff] }
  0x26   :  { %655 = vmatpush.msra.mxu3 %v105_v47  ;;  %636 = vmatpush.msra.mxu2 %v88_v49  ;;  %v178_v13 = vld [vmem:[#allocation2 + $0x3e8] sm:$0xff]  ;;  %v128_v14 = vld [vmem:[#allocation2 + $0x258] sm:$0xff]  ;;  %v145_v15 = vld [vmem:[#allocation2 + $0x2e0] sm:$0xff] }
  0x27   :  { %616 = vmatpush.msra.mxu1 %v72_v50  ;;  %597 = vmatpush.msra.mxu0 %v55_v52  ;;  %v160_v16 = vld [vmem:[#allocation2 + $0x358] sm:$0xff]  ;;  %v177_v17 = vld [vmem:[#allocation2 + $0x3e0] sm:$0xff]  ;;  %v127_v18 = vld [vmem:[#allocation2 + $0x250] sm:$0xff] }
  0x28   :  { %656 = vmatpush.msra.mxu3 %v104_v51  ;;  %637 = vmatpush.msra.mxu2 %v87_v53  ;;  %v144_v19 = vld [vmem:[#allocation2 + $0x2d8] sm:$0xff]  ;;  %v159_v20 = vld [vmem:[#allocation2 + $0x350] sm:$0xff]  ;;  %v126_v22 = vld [vmem:[#allocation2 + $0x248] sm:$0xff] }
  0x29   :  { %617 = vmatpush.msra.mxu1 %v71_v54  ;;  %598 = vmatpush.msra.mxu0 %v54_v56  ;;  %v176_v21 = vld [vmem:[#allocation2 + $0x3d8] sm:$0xff]  ;;  %v143_v23 = vld [vmem:[#allocation2 + $0x2d0] sm:$0xff]  ;;  %v158_v24 = vld [vmem:[#allocation2 + $0x348] sm:$0xff] }
  0x2a   :  { %657 = vmatpush.msra.mxu3 %v103_v55  ;;  %638 = vmatpush.msra.mxu2 %v86_v57  ;;  %v175_v25 = vld [vmem:[#allocation2 + $0x3d0] sm:$0xff]  ;;  %v45_v26 = vld [vmem:[%s1384_s0] sm:$0xff]  ;;  %v125_v27 = vld [vmem:[#allocation2 + $0x240] sm:$0xff] }
  0x2b   :  { %618 = vmatpush.msra.mxu1 %v70_v58  ;;  %599 = vmatpush.msra.mxu0 %v53_v60  ;;  %v142_v28 = vld [vmem:[#allocation2 + $0x2c8] sm:$0xff]  ;;  %515 = vst [vmem:[#allocation1] ss:$4 sm:$0xff] %v45_v26  ;;  %v157_v29 = vld [vmem:[#allocation2 + $0x340] sm:$0xff]  ;;  %v124_v31 = vld [vmem:[#allocation2 + $0x238] sm:$0xff] }
  0x2c   :  { %658 = vmatpush.msra.mxu3 %v102_v59  ;;  %639 = vmatpush.msra.mxu2 %v85_v61  ;;  %v174_v30 = vld [vmem:[#allocation2 + $0x3c8] sm:$0xff]  ;;  %v141_v32 = vld [vmem:[#allocation2 + $0x2c0] sm:$0xff]  ;;  %v156_v33 = vld [vmem:[#allocation2 + $0x338] sm:$0xff] }
  0x2d   :  { %664 = vmatpush.msrb.mxu0 %v132_v62  ;;  %619 = vmatpush.msra.mxu1 %v69_v0  ;;  %v173_v34 = vld [vmem:[#allocation2 + $0x3c0] sm:$0xff]  ;;  %v123_v35 = vld [vmem:[#allocation2 + $0x230] sm:$0xff]  ;;  %v140_v36 = vld [vmem:[#allocation2 + $0x2b8] sm:$0xff] }
  0x2e   :  { %704 = vmatpush.msrb.mxu2 %v164_v63  ;;  %659 = vmatpush.msra.mxu3 %v101_v1  ;;  %v155_v37 = vld [vmem:[#allocation2 + $0x330] sm:$0xff]  ;;  %v172_v38 = vld [vmem:[#allocation2 + $0x3b8] sm:$0xff]  ;;  %v122_v39 = vld [vmem:[#allocation2 + $0x228] sm:$0xff] }
  0x2f   :  { %665 = vmatpush.msrb.mxu0 %v131_v2  ;;  %684 = vmatpush.msrb.mxu1 %v148_v3  ;;  %v139_v40 = vld [vmem:[#allocation2 + $0x2b0] sm:$0xff]  ;;  %v154_v41 = vld [vmem:[#allocation2 + $0x328] sm:$0xff]  ;;  %v46_v43 = vld [vmem:[%s1384_s0 + $0x8] sm:$0xff] }
  0x30   :  { %705 = vmatpush.msrb.mxu2 %v163_v4  ;;  %724 = vmatpush.msrb.mxu3 %v180_v5  ;;  %v171_v42 = vld [vmem:[#allocation2 + $0x3b0] sm:$0xff]  ;;  %v121_v44 = vld [vmem:[#allocation2 + $0x220] sm:$0xff]  ;;  %v138_v45 = vld [vmem:[#allocation2 + $0x2a8] sm:$0xff]  ;;  %517 = vst [vmem:[#allocation1 + $0x20] ss:$4 sm:$0xff] %v46_v43 }
  0x31   :  { %666 = vmatpush.msrb.mxu0 %v130_v6  ;;  %685 = vmatpush.msrb.mxu1 %v147_v7  ;;  %v47_v46 = vld [vmem:[%s1384_s0 + $0x10] sm:$0xff]  ;;  %v153_v47 = vld [vmem:[#allocation2 + $0x320] sm:$0xff]  ;;  %v120_v53 = vld [vmem:[#allocation2 + $0x218] sm:$0xff] }
  0x32   :  { %706 = vmatpush.msrb.mxu2 %v162_v8  ;;  %725 = vmatpush.msrb.mxu3 %v179_v9  ;;  %v518_v48 = vld.sshfl [vmem:[#allocation1] sm:$0xff pattern:$0x73625140]  ;;  %v520_v49 = vld.sshfl [vmem:[#allocation1 + $0x10] sm:$0xff pattern:$0x73625140] }
  0x33   :  { %667 = vmatpush.msrb.mxu0 %v129_v10  ;;  %686 = vmatpush.msrb.mxu1 %v146_v11  ;;  %v1324_v50 = vld.sshfl [vmem:[#allocation1 + $0x8] sm:$0xff pattern:$0x73625140]  ;;  %v1326_v51 = vld.sshfl [vmem:[#allocation1 + $0x18] sm:$0xff pattern:$0x73625140] }
  0x34   :  { %707 = vmatpush.msrb.mxu2 %v161_v12  ;;  %726 = vmatpush.msrb.mxu3 %v178_v13  ;;  %v170_v52 = vld [vmem:[#allocation2 + $0x3a8] sm:$0xff]  ;;  %v137_v54 = vld [vmem:[#allocation2 + $0x2a0] sm:$0xff]  ;;  %526 = vst [vmem:[#allocation1] ss:$4 sm:$0xff] %v47_v46  ;;  %v152_v55 = vld [vmem:[#allocation2 + $0x318] sm:$0xff] }
  0x35   :  { %668 = vmatpush.msrb.mxu0 %v128_v14  ;;  %687 = vmatpush.msrb.mxu1 %v145_v15  ;;  %v169_v56 = vld [vmem:[#allocation2 + $0x3a0] sm:$0xff]  ;;  %v119_v57 = vld [vmem:[#allocation2 + $0x210] sm:$0xff]  ;;  %v136_v58 = vld [vmem:[#allocation2 + $0x298] sm:$0xff] }
  0x36   :  { %708 = vmatpush.msrb.mxu2 %v160_v16  ;;  %727 = vmatpush.msrb.mxu3 %v177_v17  ;;  %v151_v59 = vld [vmem:[#allocation2 + $0x310] sm:$0xff]  ;;  %v168_v60 = vld [vmem:[#allocation2 + $0x398] sm:$0xff]  ;;  %v118_v61 = vld [vmem:[#allocation2 + $0x208] sm:$0xff] }
  0x37   :  { %669 = vmatpush.msrb.mxu0 %v127_v18  ;;  %688 = vmatpush.msrb.mxu1 %v144_v19  ;;  %v135_v62 = vld [vmem:[#allocation2 + $0x290] sm:$0xff]  ;;  %v1331_v0 = vld.sshfl [vmem:[#allocation1 + $0x30] sm:$0xff pattern:$0x73625140]  ;;  %v117_v6 = vld [vmem:[#allocation2 + $0x200] sm:$0xff] }
  0x38   :  { %709 = vmatpush.msrb.mxu2 %v159_v20  ;;  %728 = vmatpush.msrb.mxu3 %v176_v21  ;;  %v48_v63 = vld [vmem:[%s1384_s0 + $0x18] sm:$0xff]  ;;  %v1333_v1 = vld.sshfl [vmem:[#allocation1 + $0x20] sm:$0xff pattern:$0x73625140]  ;;  %v150_v4 = vld [vmem:[#allocation2 + $0x308] sm:$0xff] }
  0x39   :  { %670 = vmatpush.msrb.mxu0 %v126_v22  ;;  %689 = vmatpush.msrb.mxu1 %v143_v23  ;;  %v1335_v2 = vld.sshfl [vmem:[#allocation1 + $0x38] sm:$0xff pattern:$0x73625140]  ;;  %v1337_v3 = vld.sshfl [vmem:[#allocation1 + $0x28] sm:$0xff pattern:$0x73625140] }
  0x3a   :  { %710 = vmatpush.msrb.mxu2 %v158_v24  ;;  %729 = vmatpush.msrb.mxu3 %v175_v25  ;;  %v167_v5 = vld [vmem:[#allocation2 + $0x390] sm:$0xff]  ;;  %527 = vst [vmem:[#allocation1 + $0x20] ss:$4 sm:$0xff] %v48_v63  ;;  %v134_v7 = vld [vmem:[#allocation2 + $0x288] sm:$0xff]  ;;  %v149_v8 = vld [vmem:[#allocation2 + $0x300] sm:$0xff] }
  0x3b   :  { %671 = vmatpush.msrb.mxu0 %v125_v27  ;;  %690 = vmatpush.msrb.mxu1 %v142_v28  ;;  %v166_v9 = vld [vmem:[#allocation2 + $0x388] sm:$0xff]  ;;  %v196_v10 = vld [vmem:[#allocation2 + $0x478] sm:$0xff]  ;;  %v133_v12 = vld [vmem:[#allocation2 + $0x280] sm:$0xff] }
  0x3c   :  { %711 = vmatpush.msrb.mxu2 %v157_v29  ;;  %730 = vmatpush.msrb.mxu3 %v174_v30  ;;  %v228_v11 = vld [vmem:[#allocation2 + $0x578] sm:$0xff]  ;;  %v165_v13 = vld [vmem:[#allocation2 + $0x380] sm:$0xff]  ;;  %v195_v14 = vld [vmem:[#allocation2 + $0x470] sm:$0xff] }
  0x3d   :  { %672 = vmatpush.msrb.mxu0 %v124_v31  ;;  %691 = vmatpush.msrb.mxu1 %v141_v32  ;;  %v212_v15 = vld [vmem:[#allocation2 + $0x4f8] sm:$0xff]  ;;  %v227_v16 = vld [vmem:[#allocation2 + $0x570] sm:$0xff]  ;;  %v194_v18 = vld [vmem:[#allocation2 + $0x468] sm:$0xff] }
  0x3e   :  { %712 = vmatpush.msrb.mxu2 %v156_v33  ;;  %731 = vmatpush.msrb.mxu3 %v173_v34  ;;  %v244_v17 = vld [vmem:[#allocation2 + $0x5f8] sm:$0xff]  ;;  %v211_v19 = vld [vmem:[#allocation2 + $0x4f0] sm:$0xff]  ;;  %v226_v20 = vld [vmem:[#allocation2 + $0x568] sm:$0xff] }
  0x3f   :  { %673 = vmatpush.msrb.mxu0 %v123_v35  ;;  %692 = vmatpush.msrb.mxu1 %v140_v36  ;;  %v243_v21 = vld [vmem:[#allocation2 + $0x5f0] sm:$0xff]  ;;  %v193_v22 = vld [vmem:[#allocation2 + $0x460] sm:$0xff]  ;;  %v210_v23 = vld [vmem:[#allocation2 + $0x4e8] sm:$0xff] }
  0x40   :  { %713 = vmatpush.msrb.mxu2 %v155_v37  ;;  %732 = vmatpush.msrb.mxu3 %v172_v38  ;;  %v225_v24 = vld [vmem:[#allocation2 + $0x560] sm:$0xff]  ;;  %v242_v25 = vld [vmem:[#allocation2 + $0x5e8] sm:$0xff]  ;;  %v1341_v26 = vld.sshfl [vmem:[#allocation1] sm:$0xff pattern:$0x73625140] }
  0x41   :  { %674 = vmatpush.msrb.mxu0 %v122_v39  ;;  %693 = vmatpush.msrb.mxu1 %v139_v40  ;;  %v1343_v27 = vld.sshfl [vmem:[#allocation1 + $0x10] sm:$0xff pattern:$0x73625140]  ;;  %v1345_v28 = vld.sshfl [vmem:[#allocation1 + $0x8] sm:$0xff pattern:$0x73625140] }
  0x42   :  { %714 = vmatpush.msrb.mxu2 %v154_v41  ;;  %733 = vmatpush.msrb.mxu3 %v171_v42  ;;  %v192_v29 = vld [vmem:[#allocation2 + $0x458] sm:$0xff]  ;;  %v1350_v31 = vld.sshfl [vmem:[#allocation1 + $0x18] sm:$0xff pattern:$0x73625140]  ;;  %v209_v32 = vld [vmem:[#allocation2 + $0x4e0] sm:$0xff] }
  0x43   :  { %675 = vmatpush.msrb.mxu0 %v121_v44  ;;  %694 = vmatpush.msrb.mxu1 %v138_v45  ;;  %v49_v30 = vld [vmem:[%s1384_s0 + $0x20] sm:$0xff]  ;;  %v241_v34 = vld [vmem:[#allocation2 + $0x5e0] sm:$0xff]  ;;  %v191_v35 = vld [vmem:[#allocation2 + $0x450] sm:$0xff] }
  0x44   :  { %715 = vmatpush.msrb.mxu2 %v153_v47  ;;  %734 = vmatpush.msrb.mxu3 %v170_v52  ;;  %v224_v33 = vld [vmem:[#allocation2 + $0x558] sm:$0xff]  ;;  %536 = vst [vmem:[#allocation1] ss:$4 sm:$0xff] %v49_v30  ;;  %v223_v37 = vld [vmem:[#allocation2 + $0x550] sm:$0xff]  ;;  %v190_v39 = vld [vmem:[#allocation2 + $0x448] sm:$0xff] }
  0x45   :  { %676 = vmatpush.msrb.mxu0 %v120_v53  ;;  %695 = vmatpush.msrb.mxu1 %v137_v54  ;;  %v208_v36 = vld [vmem:[#allocation2 + $0x4d8] sm:$0xff]  ;;  %v207_v40 = vld [vmem:[#allocation2 + $0x4d0] sm:$0xff]  ;;  %v222_v41 = vld [vmem:[#allocation2 + $0x548] sm:$0xff] }
  0x46   :  { %716 = vmatpush.msrb.mxu2 %v152_v55  ;;  %735 = vmatpush.msrb.mxu3 %v169_v56  ;;  %v240_v38 = vld [vmem:[#allocation2 + $0x5d8] sm:$0xff]  ;;  %v239_v42 = vld [vmem:[#allocation2 + $0x5d0] sm:$0xff]  ;;  %v189_v43 = vld [vmem:[#allocation2 + $0x440] sm:$0xff] }
  0x47   :  { %677 = vmatpush.msrb.mxu0 %v119_v57  ;;  %696 = vmatpush.msrb.mxu1 %v136_v58  ;;  %v206_v44 = vld [vmem:[#allocation2 + $0x4c8] sm:$0xff]  ;;  %v221_v45 = vld [vmem:[#allocation2 + $0x540] sm:$0xff]  ;;  %v188_v47 = vld [vmem:[#allocation2 + $0x438] sm:$0xff] }
  0x48   :  { %717 = vmatpush.msrb.mxu2 %v151_v59  ;;  %736 = vmatpush.msrb.mxu3 %v168_v60  ;;  %v238_v46 = vld [vmem:[#allocation2 + $0x5c8] sm:$0xff]  ;;  %v204_v52 = vld [vmem:[#allocation2 + $0x4b8] sm:$0xff]  ;;  %v219_v53 = vld [vmem:[#allocation2 + $0x530] sm:$0xff] }
  0x49   :  { %678 = vmatpush.msrb.mxu0 %v118_v61  ;;  %697 = vmatpush.msrb.mxu1 %v135_v62  ;;  %v236_v54 = vld [vmem:[#allocation2 + $0x5b8] sm:$0xff]  ;;  %v186_v55 = vld [vmem:[#allocation2 + $0x428] sm:$0xff]  ;;  %v203_v56 = vld [vmem:[#allocation2 + $0x4b0] sm:$0xff] }
  0x4a   :  { %718 = vmatpush.msrb.mxu2 %v150_v4  ;;  %737 = vmatpush.msrb.mxu3 %v167_v5  ;;  %v218_v57 = vld [vmem:[#allocation2 + $0x528] sm:$0xff]  ;;  %v235_v58 = vld [vmem:[#allocation2 + $0x5b0] sm:$0xff]  ;;  %v185_v59 = vld [vmem:[#allocation2 + $0x420] sm:$0xff] }
  0x4b   :  { %679 = vmatpush.msrb.mxu0 %v117_v6  ;;  %698 = vmatpush.msrb.mxu1 %v134_v7  ;;  %v202_v60 = vld [vmem:[#allocation2 + $0x4a8] sm:$0xff]  ;;  %v217_v61 = vld [vmem:[#allocation2 + $0x520] sm:$0xff]  ;;  %v184_v63 = vld [vmem:[#allocation2 + $0x418] sm:$0xff] }
  0x4c   :  { %719 = vmatpush.msrb.mxu2 %v149_v8  ;;  %738 = vmatpush.msrb.mxu3 %v166_v9  ;;  %v234_v62 = vld [vmem:[#allocation2 + $0x5a8] sm:$0xff]  ;;  %v200_v4 = vld [vmem:[#allocation2 + $0x498] sm:$0xff]  ;;  %v215_v5 = vld [vmem:[#allocation2 + $0x510] sm:$0xff] }
  0x4d   :  { %600 = vmatmul.f32.vlgmr.msra.gmra.mxu0 %v518_v48  ;;  %640 = vmatmul.f32.vlgmr.msra.gmra.mxu2 %v520_v49  ;;  %v205_v48 = vld [vmem:[#allocation2 + $0x4c0] sm:$0xff]  ;;  %v220_v49 = vld [vmem:[#allocation2 + $0x538] sm:$0xff]  ;;  %v182_v7 = vld [vmem:[#allocation2 + $0x408] sm:$0xff] }
  0x4e   :  { %744 = vmatpush.msra.mxu0 %v196_v10  ;;  %784 = vmatpush.msra.mxu2 %v228_v11  ;;  %v232_v6 = vld [vmem:[#allocation2 + $0x598] sm:$0xff]  ;;  %v199_v8 = vld [vmem:[#allocation2 + $0x490] sm:$0xff]  ;;  %v214_v9 = vld [vmem:[#allocation2 + $0x508] sm:$0xff] }
  0x4f   :  { %699 = vmatpush.msrb.mxu1 %v133_v12  ;;  %739 = vmatpush.msrb.mxu3 %v165_v13  ;;  %v231_v10 = vld [vmem:[#allocation2 + $0x590] sm:$0xff]  ;;  %v181_v11 = vld [vmem:[#allocation2 + $0x400] sm:$0xff]  ;;  %v198_v12 = vld [vmem:[#allocation2 + $0x488] sm:$0xff] }
  0x50   :  { %620 = vmatmul.f32.vlgmr.msra.gmra.mxu1 %v1324_v50  ;;  %660 = vmatmul.f32.vlgmr.msra.gmra.mxu3 %v1326_v51  ;;  %v237_v50 = vld [vmem:[#allocation2 + $0x5c0] sm:$0xff]  ;;  %v187_v51 = vld [vmem:[#allocation2 + $0x430] sm:$0xff] }
  0x51   :  { %745 = vmatpush.msra.mxu0 %v195_v14  ;;  %764 = vmatpush.msra.mxu1 %v212_v15  ;;  %v213_v13 = vld [vmem:[#allocation2 + $0x500] sm:$0xff]  ;;  %v230_v14 = vld [vmem:[#allocation2 + $0x588] sm:$0xff]  ;;  %v260_v15 = vld [vmem:[#allocation2 + $0x678] sm:$0xff] }
  0x52   :  { %785 = vmatpush.msra.mxu2 %v227_v16  ;;  %804 = vmatpush.msra.mxu3 %v244_v17  ;;  %v292_v16 = vld [vmem:[#allocation2 + $0x778] sm:$0xff]  ;;  %v197_v17 = vld [vmem:[#allocation2 + $0x480] sm:$0xff] }
  0x53   :  { %746 = vmatpush.msra.mxu0 %v194_v18  ;;  %765 = vmatpush.msra.mxu1 %v211_v19  ;;  %v229_v18 = vld [vmem:[#allocation2 + $0x580] sm:$0xff]  ;;  %v259_v19 = vld [vmem:[#allocation2 + $0x670] sm:$0xff] }
  0x54   :  { %786 = vmatpush.msra.mxu2 %v226_v20  ;;  %805 = vmatpush.msra.mxu3 %v243_v21  ;;  %v276_v20 = vld [vmem:[#allocation2 + $0x6f8] sm:$0xff]  ;;  %v291_v21 = vld [vmem:[#allocation2 + $0x770] sm:$0xff]  ;;  %v257_v30 = vld [vmem:[#allocation2 + $0x660] sm:$0xff] }
  0x55   :  { %747 = vmatpush.msra.mxu0 %v193_v22  ;;  %766 = vmatpush.msra.mxu1 %v210_v23  ;;  %v308_v22 = vld [vmem:[#allocation2 + $0x7f8] sm:$0xff]  ;;  %v258_v23 = vld [vmem:[#allocation2 + $0x668] sm:$0xff] }
  0x56   :  { %787 = vmatpush.msra.mxu2 %v225_v24  ;;  %806 = vmatpush.msra.mxu3 %v242_v25  ;;  %v275_v24 = vld [vmem:[#allocation2 + $0x6f0] sm:$0xff]  ;;  %v290_v25 = vld [vmem:[#allocation2 + $0x768] sm:$0xff] }
  0x57   :  { %720 = vmatmul.f32.vlgmr.msrb.gmra.mxu2 %v1331_v0  ;;  %748 = vmatpush.msra.mxu0 %v192_v29  ;;  %v201_v0 = vld [vmem:[#allocation2 + $0x4a0] sm:$0xff]  ;;  %v307_v29 = vld [vmem:[#allocation2 + $0x7f0] sm:$0xff] }
  0x58   :  { %767 = vmatpush.msra.mxu1 %v209_v32  ;;  %788 = vmatpush.msra.mxu2 %v224_v33  ;;  %v1364_v32 = vld.sshfl [vmem:[#allocation1 + $0x28] sm:$0xff pattern:$0x73625140]  ;;  %v274_v33 = vld [vmem:[#allocation2 + $0x6e8] sm:$0xff] }
  0x59   :  { %807 = vmatpush.msra.mxu3 %v241_v34  ;;  %680 = vmatmul.f32.vlgmr.msrb.gmra.mxu0 %v1333_v1  ;;  %v216_v1 = vld [vmem:[#allocation2 + $0x518] sm:$0xff]  ;;  %v50_v34 = vld [vmem:[%s1384_s0 + $0x28] sm:$0xff] }
  0x5a   :  { %740 = vmatmul.f32.vlgmr.msrb.gmra.mxu3 %v1335_v2  ;;  %749 = vmatpush.msra.mxu0 %v191_v35  ;;  %v233_v2 = vld [vmem:[#allocation2 + $0x5a0] sm:$0xff]  ;;  %v306_v35 = vld [vmem:[#allocation2 + $0x7e8] sm:$0xff] }
  0x5b   :  { %768 = vmatpush.msra.mxu1 %v208_v36  ;;  %789 = vmatpush.msra.mxu2 %v223_v37  ;;  %v256_v36 = vld [vmem:[#allocation2 + $0x658] sm:$0xff]  ;;  %v273_v37 = vld [vmem:[#allocation2 + $0x6e0] sm:$0xff] }
  0x5c   :  { %808 = vmatpush.msra.mxu3 %v240_v38  ;;  %700 = vmatmul.f32.vlgmr.msrb.gmra.mxu1 %v1337_v3  ;;  %v183_v3 = vld [vmem:[#allocation2 + $0x410] sm:$0xff]  ;;  %v288_v38 = vld [vmem:[#allocation2 + $0x758] sm:$0xff] }
  0x5d   :  { %750 = vmatpush.msra.mxu0 %v190_v39  ;;  %769 = vmatpush.msra.mxu1 %v207_v40  ;;  %v305_v39 = vld [vmem:[#allocation2 + $0x7e0] sm:$0xff]  ;;  %v255_v40 = vld [vmem:[#allocation2 + $0x650] sm:$0xff] }
  0x5e   :  { %790 = vmatpush.msra.mxu2 %v222_v41  ;;  %809 = vmatpush.msra.mxu3 %v239_v42  ;;  %v272_v41 = vld [vmem:[#allocation2 + $0x6d8] sm:$0xff]  ;;  %v287_v42 = vld [vmem:[#allocation2 + $0x750] sm:$0xff] }
  0x5f   :  { %751 = vmatpush.msra.mxu0 %v189_v43  ;;  %770 = vmatpush.msra.mxu1 %v206_v44  ;;  %v304_v43 = vld [vmem:[#allocation2 + $0x7d8] sm:$0xff]  ;;  %v254_v44 = vld [vmem:[#allocation2 + $0x648] sm:$0xff] }
  0x60   :  { %791 = vmatpush.msra.mxu2 %v221_v45  ;;  %810 = vmatpush.msra.mxu3 %v238_v46  ;;  %v271_v45 = vld [vmem:[#allocation2 + $0x6d0] sm:$0xff]  ;;  %v286_v46 = vld [vmem:[#allocation2 + $0x748] sm:$0xff] }
  0x61   :  { %752 = vmatpush.msra.mxu0 %v188_v47  ;;  %771 = vmatpush.msra.mxu1 %v205_v48  ;;  %v303_v47 = vld [vmem:[#allocation2 + $0x7d0] sm:$0xff]  ;;  %v253_v48 = vld [vmem:[#allocation2 + $0x640] sm:$0xff] }
  0x62   :  { %792 = vmatpush.msra.mxu2 %v220_v49  ;;  %811 = vmatpush.msra.mxu3 %v237_v50  ;;  %v270_v49 = vld [vmem:[#allocation2 + $0x6c8] sm:$0xff]  ;;  %v285_v50 = vld [vmem:[#allocation2 + $0x740] sm:$0xff] }
  0x63   :  { %753 = vmatpush.msra.mxu0 %v187_v51  ;;  %772 = vmatpush.msra.mxu1 %v204_v52  ;;  %v302_v51 = vld [vmem:[#allocation2 + $0x7c8] sm:$0xff]  ;;  %v252_v52 = vld [vmem:[#allocation2 + $0x638] sm:$0xff] }
  0x64   :  { %793 = vmatpush.msra.mxu2 %v219_v53  ;;  %812 = vmatpush.msra.mxu3 %v236_v54  ;;  %v269_v53 = vld [vmem:[#allocation2 + $0x6c0] sm:$0xff]  ;;  %v284_v54 = vld [vmem:[#allocation2 + $0x738] sm:$0xff] }
  0x65   :  { %754 = vmatpush.msra.mxu0 %v186_v55  ;;  %773 = vmatpush.msra.mxu1 %v203_v56  ;;  %v301_v55 = vld [vmem:[#allocation2 + $0x7c0] sm:$0xff]  ;;  %v251_v56 = vld [vmem:[#allocation2 + $0x630] sm:$0xff] }
  0x66   :  { %794 = vmatpush.msra.mxu2 %v218_v57  ;;  %813 = vmatpush.msra.mxu3 %v235_v58  ;;  %v268_v57 = vld [vmem:[#allocation2 + $0x6b8] sm:$0xff]  ;;  %v283_v58 = vld [vmem:[#allocation2 + $0x730] sm:$0xff] }
  0x67   :  { %755 = vmatpush.msra.mxu0 %v185_v59  ;;  %774 = vmatpush.msra.mxu1 %v202_v60  ;;  %v300_v59 = vld [vmem:[#allocation2 + $0x7b8] sm:$0xff]  ;;  %v250_v60 = vld [vmem:[#allocation2 + $0x628] sm:$0xff] }
  0x68   :  { %795 = vmatpush.msra.mxu2 %v217_v61  ;;  %814 = vmatpush.msra.mxu3 %v234_v62  ;;  %v267_v61 = vld [vmem:[#allocation2 + $0x6b0] sm:$0xff]  ;;  %v282_v62 = vld [vmem:[#allocation2 + $0x728] sm:$0xff] }
  0x69   :  { %756 = vmatpush.msra.mxu0 %v184_v63  ;;  %775 = vmatpush.msra.mxu1 %v201_v0  ;;  %v299_v63 = vld [vmem:[#allocation2 + $0x7b0] sm:$0xff]  ;;  %v249_v0 = vld [vmem:[#allocation2 + $0x620] sm:$0xff] }
  0x6a   :  { %796 = vmatpush.msra.mxu2 %v216_v1  ;;  %815 = vmatpush.msra.mxu3 %v233_v2  ;;  %v266_v1 = vld [vmem:[#allocation2 + $0x6a8] sm:$0xff]  ;;  %v281_v2 = vld [vmem:[#allocation2 + $0x720] sm:$0xff] }
  0x6b   :  { %757 = vmatpush.msra.mxu0 %v183_v3  ;;  %776 = vmatpush.msra.mxu1 %v200_v4  ;;  %v298_v3 = vld [vmem:[#allocation2 + $0x7a8] sm:$0xff]  ;;  %v248_v4 = vld [vmem:[#allocation2 + $0x618] sm:$0xff] }
  0x6c   :  { %797 = vmatpush.msra.mxu2 %v215_v5  ;;  %816 = vmatpush.msra.mxu3 %v232_v6  ;;  %v265_v5 = vld [vmem:[#allocation2 + $0x6a0] sm:$0xff]  ;;  %v280_v6 = vld [vmem:[#allocation2 + $0x718] sm:$0xff] }
  0x6d   :  { %758 = vmatpush.msra.mxu0 %v182_v7  ;;  %777 = vmatpush.msra.mxu1 %v199_v8  ;;  %v297_v7 = vld [vmem:[#allocation2 + $0x7a0] sm:$0xff]  ;;  %v247_v8 = vld [vmem:[#allocation2 + $0x610] sm:$0xff] }
  0x6e   :  { %798 = vmatpush.msra.mxu2 %v214_v9  ;;  %817 = vmatpush.msra.mxu3 %v231_v10  ;;  %v264_v9 = vld [vmem:[#allocation2 + $0x698] sm:$0xff]  ;;  %v279_v10 = vld [vmem:[#allocation2 + $0x710] sm:$0xff] }
  0x6f   :  { %759 = vmatpush.msra.mxu0 %v181_v11  ;;  %778 = vmatpush.msra.mxu1 %v198_v12  ;;  %v296_v11 = vld [vmem:[#allocation2 + $0x798] sm:$0xff]  ;;  %v246_v12 = vld [vmem:[#allocation2 + $0x608] sm:$0xff] }
  0x70   :  { %799 = vmatpush.msra.mxu2 %v213_v13  ;;  %818 = vmatpush.msra.mxu3 %v230_v14  ;;  %v263_v13 = vld [vmem:[#allocation2 + $0x690] sm:$0xff]  ;;  %v278_v14 = vld [vmem:[#allocation2 + $0x708] sm:$0xff] }
  0x71   :  { %760 = vmatmul.f32.vlgmr.msra.gmra.mxu0 %v1341_v26  ;;  %800 = vmatmul.f32.vlgmr.msra.gmra.mxu2 %v1343_v27  ;;  %v1360_v26 = vld.sshfl [vmem:[#allocation1 + $0x20] sm:$0xff pattern:$0x73625140]  ;;  %v1362_v27 = vld.sshfl [vmem:[#allocation1 + $0x30] sm:$0xff pattern:$0x73625140] }
  0x72   :  { %824 = vmatpush.msrb.mxu0 %v260_v15  ;;  %864 = vmatpush.msrb.mxu2 %v292_v16  ;;  %v295_v15 = vld [vmem:[#allocation2 + $0x790] sm:$0xff]  ;;  %v245_v16 = vld [vmem:[#allocation2 + $0x600] sm:$0xff] }
  0x73   :  { %779 = vmatpush.msra.mxu1 %v197_v17  ;;  %819 = vmatpush.msra.mxu3 %v229_v18  ;;  %v262_v17 = vld [vmem:[#allocation2 + $0x688] sm:$0xff]  ;;  %v277_v18 = vld [vmem:[#allocation2 + $0x700] sm:$0xff] }
  0x74   :  { %780 = vmatmul.f32.vlgmr.msra.gmra.mxu1 %v1345_v28  ;;  %820 = vmatmul.f32.vlgmr.msra.gmra.mxu3 %v1350_v31  ;;  %v1369_v28 = vld.sshfl [vmem:[#allocation1 + $0x38] sm:$0xff pattern:$0x73625140]  ;;  %v289_v31 = vld [vmem:[#allocation2 + $0x760] sm:$0xff] }
  0x75   :  { %825 = vmatpush.msrb.mxu0 %v259_v19  ;;  %844 = vmatpush.msrb.mxu1 %v276_v20  ;;  %537 = vst [vmem:[#allocation1 + $0x20] ss:$4 sm:$0xff] %v50_v34  ;;  %v294_v19 = vld [vmem:[#allocation2 + $0x788] sm:$0xff]  ;;  %v324_v20 = vld [vmem:[#allocation2 + $0x878] sm:$0xff]  ;;  %v339_v34 = vld [vmem:[#allocation2 + $0x8f0] sm:$0xff] }
  0x76   :  { %865 = vmatpush.msrb.mxu2 %v291_v21  ;;  %884 = vmatpush.msrb.mxu3 %v308_v22  ;;  %v356_v21 = vld [vmem:[#allocation2 + $0x978] sm:$0xff]  ;;  %v261_v22 = vld [vmem:[#allocation2 + $0x680] sm:$0xff] }
  0x77   :  { %826 = vmatpush.msrb.mxu0 %v258_v23  ;;  %845 = vmatpush.msrb.mxu1 %v275_v24  ;;  %v293_v23 = vld [vmem:[#allocation2 + $0x780] sm:$0xff]  ;;  %v323_v24 = vld [vmem:[#allocation2 + $0x870] sm:$0xff] }
  0x78   :  { %866 = vmatpush.msrb.mxu2 %v290_v25  ;;  %885 = vmatpush.msrb.mxu3 %v307_v29  ;;  %v340_v25 = vld [vmem:[#allocation2 + $0x8f8] sm:$0xff]  ;;  %v355_v29 = vld [vmem:[#allocation2 + $0x970] sm:$0xff] }
  0x79   :  { %827 = vmatpush.msrb.mxu0 %v257_v30  ;;  %846 = vmatpush.msrb.mxu1 %v274_v33  ;;  %v372_v30 = vld [vmem:[#allocation2 + $0x9f8] sm:$0xff]  ;;  %v322_v33 = vld [vmem:[#allocation2 + $0x868] sm:$0xff] }
  0x7a   :  { %867 = vmatpush.msrb.mxu2 %v289_v31  ;;  %886 = vmatpush.msrb.mxu3 %v306_v35  ;;  %v354_v31 = vld [vmem:[#allocation2 + $0x968] sm:$0xff] }
  0x7b   :  { %828 = vmatpush.msrb.mxu0 %v256_v36  ;;  %847 = vmatpush.msrb.mxu1 %v273_v37  ;;  %v338_v35 = vld [vmem:[#allocation2 + $0x8e8] sm:$0xff]  ;;  %v353_v36 = vld [vmem:[#allocation2 + $0x960] sm:$0xff] }
  0x7c   :  { %868 = vmatpush.msrb.mxu2 %v288_v38  ;;  %887 = vmatpush.msrb.mxu3 %v305_v39  ;;  %v370_v37 = vld [vmem:[#allocation2 + $0x9e8] sm:$0xff]  ;;  %v320_v38 = vld [vmem:[#allocation2 + $0x858] sm:$0xff]  ;;  %v369_v39 = vld [vmem:[#allocation2 + $0x9e0] sm:$0xff] }
  0x7d   :  { %829 = vmatpush.msrb.mxu0 %v255_v40  ;;  %848 = vmatpush.msrb.mxu1 %v272_v41  ;;  %v319_v40 = vld [vmem:[#allocation2 + $0x850] sm:$0xff]  ;;  %v336_v41 = vld [vmem:[#allocation2 + $0x8d8] sm:$0xff] }
  0x7e   :  { %869 = vmatpush.msrb.mxu2 %v287_v42  ;;  %888 = vmatpush.msrb.mxu3 %v304_v43  ;;  %v351_v42 = vld [vmem:[#allocation2 + $0x950] sm:$0xff]  ;;  %v368_v43 = vld [vmem:[#allocation2 + $0x9d8] sm:$0xff] }
  0x7f   :  { %830 = vmatpush.msrb.mxu0 %v254_v44  ;;  %849 = vmatpush.msrb.mxu1 %v271_v45  ;;  %v318_v44 = vld [vmem:[#allocation2 + $0x848] sm:$0xff]  ;;  %v335_v45 = vld [vmem:[#allocation2 + $0x8d0] sm:$0xff] }
  0x80   :  { %870 = vmatpush.msrb.mxu2 %v286_v46  ;;  %889 = vmatpush.msrb.mxu3 %v303_v47  ;;  %v350_v46 = vld [vmem:[#allocation2 + $0x948] sm:$0xff]  ;;  %v367_v47 = vld [vmem:[#allocation2 + $0x9d0] sm:$0xff] }
  0x81   :  { %831 = vmatpush.msrb.mxu0 %v253_v48  ;;  %850 = vmatpush.msrb.mxu1 %v270_v49  ;;  %v317_v48 = vld [vmem:[#allocation2 + $0x840] sm:$0xff]  ;;  %v334_v49 = vld [vmem:[#allocation2 + $0x8c8] sm:$0xff] }
  0x82   :  { %871 = vmatpush.msrb.mxu2 %v285_v50  ;;  %890 = vmatpush.msrb.mxu3 %v302_v51  ;;  %v349_v50 = vld [vmem:[#allocation2 + $0x940] sm:$0xff]  ;;  %v366_v51 = vld [vmem:[#allocation2 + $0x9c8] sm:$0xff] }
  0x83   :  { %832 = vmatpush.msrb.mxu0 %v252_v52  ;;  %851 = vmatpush.msrb.mxu1 %v269_v53  ;;  %v316_v52 = vld [vmem:[#allocation2 + $0x838] sm:$0xff]  ;;  %v333_v53 = vld [vmem:[#allocation2 + $0x8c0] sm:$0xff] }
  0x84   :  { %872 = vmatpush.msrb.mxu2 %v284_v54  ;;  %891 = vmatpush.msrb.mxu3 %v301_v55  ;;  %v348_v54 = vld [vmem:[#allocation2 + $0x938] sm:$0xff]  ;;  %v365_v55 = vld [vmem:[#allocation2 + $0x9c0] sm:$0xff] }
  0x85   :  { %833 = vmatpush.msrb.mxu0 %v251_v56  ;;  %852 = vmatpush.msrb.mxu1 %v268_v57  ;;  %v315_v56 = vld [vmem:[#allocation2 + $0x830] sm:$0xff]  ;;  %v332_v57 = vld [vmem:[#allocation2 + $0x8b8] sm:$0xff] }
  0x86   :  { %873 = vmatpush.msrb.mxu2 %v283_v58  ;;  %892 = vmatpush.msrb.mxu3 %v300_v59  ;;  %v347_v58 = vld [vmem:[#allocation2 + $0x930] sm:$0xff]  ;;  %v364_v59 = vld [vmem:[#allocation2 + $0x9b8] sm:$0xff] }
  0x87   :  { %834 = vmatpush.msrb.mxu0 %v250_v60  ;;  %853 = vmatpush.msrb.mxu1 %v267_v61  ;;  %v314_v60 = vld [vmem:[#allocation2 + $0x828] sm:$0xff]  ;;  %v331_v61 = vld [vmem:[#allocation2 + $0x8b0] sm:$0xff] }
  0x88   :  { %874 = vmatpush.msrb.mxu2 %v282_v62  ;;  %893 = vmatpush.msrb.mxu3 %v299_v63  ;;  %v346_v62 = vld [vmem:[#allocation2 + $0x928] sm:$0xff]  ;;  %v363_v63 = vld [vmem:[#allocation2 + $0x9b0] sm:$0xff] }
  0x89   :  { %835 = vmatpush.msrb.mxu0 %v249_v0  ;;  %854 = vmatpush.msrb.mxu1 %v266_v1  ;;  %v313_v0 = vld [vmem:[#allocation2 + $0x820] sm:$0xff]  ;;  %v330_v1 = vld [vmem:[#allocation2 + $0x8a8] sm:$0xff] }
  0x8a   :  { %875 = vmatpush.msrb.mxu2 %v281_v2  ;;  %894 = vmatpush.msrb.mxu3 %v298_v3  ;;  %v345_v2 = vld [vmem:[#allocation2 + $0x920] sm:$0xff]  ;;  %v362_v3 = vld [vmem:[#allocation2 + $0x9a8] sm:$0xff] }
  0x8b   :  { %836 = vmatpush.msrb.mxu0 %v248_v4  ;;  %855 = vmatpush.msrb.mxu1 %v265_v5  ;;  %v312_v4 = vld [vmem:[#allocation2 + $0x818] sm:$0xff]  ;;  %v329_v5 = vld [vmem:[#allocation2 + $0x8a0] sm:$0xff] }
  0x8c   :  { %876 = vmatpush.msrb.mxu2 %v280_v6  ;;  %895 = vmatpush.msrb.mxu3 %v297_v7  ;;  %v344_v6 = vld [vmem:[#allocation2 + $0x918] sm:$0xff]  ;;  %v361_v7 = vld [vmem:[#allocation2 + $0x9a0] sm:$0xff] }
  0x8d   :  { %837 = vmatpush.msrb.mxu0 %v247_v8  ;;  %856 = vmatpush.msrb.mxu1 %v264_v9  ;;  %v311_v8 = vld [vmem:[#allocation2 + $0x810] sm:$0xff]  ;;  %v328_v9 = vld [vmem:[#allocation2 + $0x898] sm:$0xff] }
  0x8e   :  { %877 = vmatpush.msrb.mxu2 %v279_v10  ;;  %896 = vmatpush.msrb.mxu3 %v296_v11  ;;  %v343_v10 = vld [vmem:[#allocation2 + $0x910] sm:$0xff]  ;;  %v360_v11 = vld [vmem:[#allocation2 + $0x998] sm:$0xff] }
  0x8f   :  { %838 = vmatpush.msrb.mxu0 %v246_v12  ;;  %857 = vmatpush.msrb.mxu1 %v263_v13  ;;  %v310_v12 = vld [vmem:[#allocation2 + $0x808] sm:$0xff]  ;;  %v327_v13 = vld [vmem:[#allocation2 + $0x890] sm:$0xff] }
  0x90   :  { %878 = vmatpush.msrb.mxu2 %v278_v14  ;;  %897 = vmatpush.msrb.mxu3 %v295_v15  ;;  %v342_v14 = vld [vmem:[#allocation2 + $0x908] sm:$0xff]  ;;  %v359_v15 = vld [vmem:[#allocation2 + $0x990] sm:$0xff] }
  0x91   :  { %839 = vmatpush.msrb.mxu0 %v245_v16  ;;  %858 = vmatpush.msrb.mxu1 %v262_v17  ;;  %v309_v16 = vld [vmem:[#allocation2 + $0x800] sm:$0xff]  ;;  %v326_v17 = vld [vmem:[#allocation2 + $0x888] sm:$0xff] }
  0x92   :  { %879 = vmatpush.msrb.mxu2 %v277_v18  ;;  %898 = vmatpush.msrb.mxu3 %v294_v19  ;;  %v341_v18 = vld [vmem:[#allocation2 + $0x900] sm:$0xff]  ;;  %v358_v19 = vld [vmem:[#allocation2 + $0x988] sm:$0xff] }
  0x93   :  { %840 = vmatmul.f32.vlgmr.msrb.gmra.mxu0 %v1360_v26  ;;  %880 = vmatmul.f32.vlgmr.msrb.gmra.mxu2 %v1362_v27  ;;  %v371_v26 = vld [vmem:[#allocation2 + $0x9f0] sm:$0xff]  ;;  %v321_v27 = vld [vmem:[#allocation2 + $0x860] sm:$0xff] }
  0x94   :  { %904 = vmatpush.msra.mxu0 %v324_v20  ;;  %944 = vmatpush.msra.mxu2 %v356_v21  ;;  %v538_v20 = vld.sshfl [vmem:[#allocation1] sm:$0xff pattern:$0x73625140]  ;;  %v540_v21 = vld.sshfl [vmem:[#allocation1 + $0x10] sm:$0xff pattern:$0x73625140] }
  0x95   :  { %859 = vmatpush.msrb.mxu1 %v261_v22  ;;  %899 = vmatpush.msrb.mxu3 %v293_v23  ;;  %v388_v22 = vld [vmem:[#allocation2 + $0xa78] sm:$0xff] }
  0x96   :  { %860 = vmatmul.f32.vlgmr.msrb.gmra.mxu1 %v1364_v32  ;;  %900 = vmatmul.f32.vlgmr.msrb.gmra.mxu3 %v1369_v28  ;;  %v337_v32 = vld [vmem:[#allocation2 + $0x8e0] sm:$0xff]  ;;  %v352_v28 = vld [vmem:[#allocation2 + $0x958] sm:$0xff] }
  0x97   :  { %905 = vmatpush.msra.mxu0 %v323_v24  ;;  %924 = vmatpush.msra.mxu1 %v340_v25  ;;  %v420_v23 = vld [vmem:[#allocation2 + $0xb78] sm:$0xff]  ;;  %v325_v24 = vld [vmem:[#allocation2 + $0x880] sm:$0xff] }
  0x98   :  { %945 = vmatpush.msra.mxu2 %v355_v29  ;;  %964 = vmatpush.msra.mxu3 %v372_v30  ;;  %v357_v25 = vld [vmem:[#allocation2 + $0x980] sm:$0xff]  ;;  %v541_v30 = vld.sshfl [vmem:[#allocation1 + $0x18] sm:$0xff pattern:$0x73625140] }
  0x99   :  { %906 = vmatpush.msra.mxu0 %v322_v33  ;;  %925 = vmatpush.msra.mxu1 %v339_v34  ;;  %v539_v29 = vld.sshfl [vmem:[#allocation1 + $0x8] sm:$0xff pattern:$0x73625140]  ;;  %v387_v33 = vld [vmem:[#allocation2 + $0xa70] sm:$0xff]  ;;  %v404_v34 = vld [vmem:[#allocation2 + $0xaf8] sm:$0xff] }
  0x9a   :  { %946 = vmatpush.msra.mxu2 %v354_v31  ;;  %965 = vmatpush.msra.mxu3 %v371_v26  ;;  %v419_v31 = vld [vmem:[#allocation2 + $0xb70] sm:$0xff]  ;;  %v436_v26 = vld [vmem:[#allocation2 + $0xbf8] sm:$0xff] }
  0x9b   :  { %907 = vmatpush.msra.mxu0 %v321_v27  ;;  %926 = vmatpush.msra.mxu1 %v338_v35  ;;  %v386_v27 = vld [vmem:[#allocation2 + $0xa68] sm:$0xff]  ;;  %v403_v35 = vld [vmem:[#allocation2 + $0xaf0] sm:$0xff] }
  0x9c   :  { %947 = vmatpush.msra.mxu2 %v353_v36  ;;  %966 = vmatpush.msra.mxu3 %v370_v37  ;;  %v418_v36 = vld [vmem:[#allocation2 + $0xb68] sm:$0xff]  ;;  %v435_v37 = vld [vmem:[#allocation2 + $0xbf0] sm:$0xff] }
  0x9d   :  { %908 = vmatpush.msra.mxu0 %v320_v38  ;;  %927 = vmatpush.msra.mxu1 %v337_v32  ;;  %v385_v38 = vld [vmem:[#allocation2 + $0xa60] sm:$0xff]  ;;  %v402_v32 = vld [vmem:[#allocation2 + $0xae8] sm:$0xff] }
  0x9e   :  { %948 = vmatpush.msra.mxu2 %v352_v28  ;;  %967 = vmatpush.msra.mxu3 %v369_v39  ;;  %v417_v28 = vld [vmem:[#allocation2 + $0xb60] sm:$0xff]  ;;  %v434_v39 = vld [vmem:[#allocation2 + $0xbe8] sm:$0xff] }
  0x9f   :  { %909 = vmatpush.msra.mxu0 %v319_v40  ;;  %928 = vmatpush.msra.mxu1 %v336_v41  ;;  %v384_v40 = vld [vmem:[#allocation2 + $0xa58] sm:$0xff]  ;;  %v401_v41 = vld [vmem:[#allocation2 + $0xae0] sm:$0xff] }
  0xa0   :  { %949 = vmatpush.msra.mxu2 %v351_v42  ;;  %968 = vmatpush.msra.mxu3 %v368_v43  ;;  %v416_v42 = vld [vmem:[#allocation2 + $0xb58] sm:$0xff]  ;;  %v433_v43 = vld [vmem:[#allocation2 + $0xbe0] sm:$0xff] }
  0xa1   :  { %910 = vmatpush.msra.mxu0 %v318_v44  ;;  %929 = vmatpush.msra.mxu1 %v335_v45  ;;  %v383_v44 = vld [vmem:[#allocation2 + $0xa50] sm:$0xff]  ;;  %v400_v45 = vld [vmem:[#allocation2 + $0xad8] sm:$0xff] }
  0xa2   :  { %950 = vmatpush.msra.mxu2 %v350_v46  ;;  %969 = vmatpush.msra.mxu3 %v367_v47  ;;  %v415_v46 = vld [vmem:[#allocation2 + $0xb50] sm:$0xff]  ;;  %v432_v47 = vld [vmem:[#allocation2 + $0xbd8] sm:$0xff] }
  0xa3   :  { %911 = vmatpush.msra.mxu0 %v317_v48  ;;  %930 = vmatpush.msra.mxu1 %v334_v49  ;;  %v382_v48 = vld [vmem:[#allocation2 + $0xa48] sm:$0xff]  ;;  %v399_v49 = vld [vmem:[#allocation2 + $0xad0] sm:$0xff] }
  0xa4   :  { %951 = vmatpush.msra.mxu2 %v349_v50  ;;  %970 = vmatpush.msra.mxu3 %v366_v51  ;;  %v414_v50 = vld [vmem:[#allocation2 + $0xb48] sm:$0xff]  ;;  %v431_v51 = vld [vmem:[#allocation2 + $0xbd0] sm:$0xff] }
  0xa5   :  { %912 = vmatpush.msra.mxu0 %v316_v52  ;;  %931 = vmatpush.msra.mxu1 %v333_v53  ;;  %v381_v52 = vld [vmem:[#allocation2 + $0xa40] sm:$0xff]  ;;  %v398_v53 = vld [vmem:[#allocation2 + $0xac8] sm:$0xff] }
  0xa6   :  { %952 = vmatpush.msra.mxu2 %v348_v54  ;;  %971 = vmatpush.msra.mxu3 %v365_v55  ;;  %v413_v54 = vld [vmem:[#allocation2 + $0xb40] sm:$0xff]  ;;  %v430_v55 = vld [vmem:[#allocation2 + $0xbc8] sm:$0xff] }
  0xa7   :  { %913 = vmatpush.msra.mxu0 %v315_v56  ;;  %932 = vmatpush.msra.mxu1 %v332_v57  ;;  %v380_v56 = vld [vmem:[#allocation2 + $0xa38] sm:$0xff]  ;;  %v397_v57 = vld [vmem:[#allocation2 + $0xac0] sm:$0xff] }
  0xa8   :  { %953 = vmatpush.msra.mxu2 %v347_v58  ;;  %972 = vmatpush.msra.mxu3 %v364_v59  ;;  %v412_v58 = vld [vmem:[#allocation2 + $0xb38] sm:$0xff]  ;;  %v429_v59 = vld [vmem:[#allocation2 + $0xbc0] sm:$0xff] }
  0xa9   :  { %914 = vmatpush.msra.mxu0 %v314_v60  ;;  %933 = vmatpush.msra.mxu1 %v331_v61  ;;  %v379_v60 = vld [vmem:[#allocation2 + $0xa30] sm:$0xff]  ;;  %v396_v61 = vld [vmem:[#allocation2 + $0xab8] sm:$0xff] }
  0xaa   :  { %954 = vmatpush.msra.mxu2 %v346_v62  ;;  %973 = vmatpush.msra.mxu3 %v363_v63  ;;  %v411_v62 = vld [vmem:[#allocation2 + $0xb30] sm:$0xff]  ;;  %v428_v63 = vld [vmem:[#allocation2 + $0xbb8] sm:$0xff] }
  0xab   :  { %915 = vmatpush.msra.mxu0 %v313_v0  ;;  %934 = vmatpush.msra.mxu1 %v330_v1  ;;  %v378_v0 = vld [vmem:[#allocation2 + $0xa28] sm:$0xff]  ;;  %v395_v1 = vld [vmem:[#allocation2 + $0xab0] sm:$0xff] }
  0xac   :  { %955 = vmatpush.msra.mxu2 %v345_v2  ;;  %974 = vmatpush.msra.mxu3 %v362_v3  ;;  %v410_v2 = vld [vmem:[#allocation2 + $0xb28] sm:$0xff]  ;;  %v427_v3 = vld [vmem:[#allocation2 + $0xbb0] sm:$0xff] }
  0xad   :  { %916 = vmatpush.msra.mxu0 %v312_v4  ;;  %935 = vmatpush.msra.mxu1 %v329_v5  ;;  %v377_v4 = vld [vmem:[#allocation2 + $0xa20] sm:$0xff]  ;;  %v394_v5 = vld [vmem:[#allocation2 + $0xaa8] sm:$0xff] }
  0xae   :  { %956 = vmatpush.msra.mxu2 %v344_v6  ;;  %975 = vmatpush.msra.mxu3 %v361_v7  ;;  %v409_v6 = vld [vmem:[#allocation2 + $0xb20] sm:$0xff]  ;;  %v426_v7 = vld [vmem:[#allocation2 + $0xba8] sm:$0xff] }
  0xaf   :  { %917 = vmatpush.msra.mxu0 %v311_v8  ;;  %936 = vmatpush.msra.mxu1 %v328_v9  ;;  %v376_v8 = vld [vmem:[#allocation2 + $0xa18] sm:$0xff]  ;;  %v393_v9 = vld [vmem:[#allocation2 + $0xaa0] sm:$0xff] }
  0xb0   :  { %957 = vmatpush.msra.mxu2 %v343_v10  ;;  %976 = vmatpush.msra.mxu3 %v360_v11  ;;  %v408_v10 = vld [vmem:[#allocation2 + $0xb18] sm:$0xff]  ;;  %v425_v11 = vld [vmem:[#allocation2 + $0xba0] sm:$0xff] }
  0xb1   :  { %918 = vmatpush.msra.mxu0 %v310_v12  ;;  %937 = vmatpush.msra.mxu1 %v327_v13  ;;  %v375_v12 = vld [vmem:[#allocation2 + $0xa10] sm:$0xff]  ;;  %v392_v13 = vld [vmem:[#allocation2 + $0xa98] sm:$0xff] }
  0xb2   :  { %958 = vmatpush.msra.mxu2 %v342_v14  ;;  %977 = vmatpush.msra.mxu3 %v359_v15  ;;  %v407_v14 = vld [vmem:[#allocation2 + $0xb10] sm:$0xff]  ;;  %v424_v15 = vld [vmem:[#allocation2 + $0xb98] sm:$0xff] }
  0xb3   :  { %919 = vmatpush.msra.mxu0 %v309_v16  ;;  %938 = vmatpush.msra.mxu1 %v326_v17  ;;  %v374_v16 = vld [vmem:[#allocation2 + $0xa08] sm:$0xff]  ;;  %v391_v17 = vld [vmem:[#allocation2 + $0xa90] sm:$0xff] }
  0xb4   :  { %959 = vmatpush.msra.mxu2 %v341_v18  ;;  %978 = vmatpush.msra.mxu3 %v358_v19  ;;  %v51_v18 = vld [vmem:[%s1384_s0 + $0x30] sm:$0xff] }
  0xb5   :  { %920 = vmatmul.f32.vlgmr.msra.gmra.mxu0 %v538_v20  ;;  %960 = vmatmul.f32.vlgmr.msra.gmra.mxu2 %v540_v21  ;;  %v406_v19 = vld [vmem:[#allocation2 + $0xb08] sm:$0xff]  ;;  %v423_v20 = vld [vmem:[#allocation2 + $0xb90] sm:$0xff]  ;;  %546 = vst [vmem:[#allocation1] ss:$4 sm:$0xff] %v51_v18  ;;  %v373_v21 = vld [vmem:[#allocation2 + $0xa00] sm:$0xff] }
  0xb6   :  { %984 = vmatpush.msrb.mxu0 %v388_v22  ;;  %1024 = vmatpush.msrb.mxu2 %v420_v23  ;;  %v390_v22 = vld [vmem:[#allocation2 + $0xa88] sm:$0xff]  ;;  %v405_v23 = vld [vmem:[#allocation2 + $0xb00] sm:$0xff]  ;;  %v439_v18 = vld [vmem:[#allocation2 + $0xc10] sm:$0xff] }
  0xb7   :  { %939 = vmatpush.msra.mxu1 %v325_v24  ;;  %979 = vmatpush.msra.mxu3 %v357_v25  ;;  %v422_v24 = vld [vmem:[#allocation2 + $0xb88] sm:$0xff]  ;;  %v542_v25 = vld.sshfl [vmem:[#allocation1 + $0x20] sm:$0xff pattern:$0x73625140] }
  0xb8   :  { %940 = vmatmul.f32.vlgmr.msra.gmra.mxu1 %v539_v29  ;;  %980 = vmatmul.f32.vlgmr.msra.gmra.mxu3 %v541_v30  ;;  %v544_v29 = vld.sshfl [vmem:[#allocation1 + $0x30] sm:$0xff pattern:$0x73625140]  ;;  %v452_v30 = vld [vmem:[#allocation2 + $0xc78] sm:$0xff] }
  0xb9   :  { %985 = vmatpush.msrb.mxu0 %v387_v33  ;;  %1004 = vmatpush.msrb.mxu1 %v404_v34  ;;  %v484_v33 = vld [vmem:[#allocation2 + $0xd78] sm:$0xff]  ;;  %v389_v34 = vld [vmem:[#allocation2 + $0xa80] sm:$0xff] }
  0xba   :  { %1025 = vmatpush.msrb.mxu2 %v419_v31  ;;  %1044 = vmatpush.msrb.mxu3 %v436_v26  ;;  %v421_v31 = vld [vmem:[#allocation2 + $0xb80] sm:$0xff] }
  0xbb   :  { %986 = vmatpush.msrb.mxu0 %v386_v27  ;;  %1005 = vmatpush.msrb.mxu1 %v403_v35  ;;  %v543_v26 = vld.sshfl [vmem:[#allocation1 + $0x28] sm:$0xff pattern:$0x73625140]  ;;  %v545_v27 = vld.sshfl [vmem:[#allocation1 + $0x38] sm:$0xff pattern:$0x73625140] }
  0xbc   :  { %1026 = vmatpush.msrb.mxu2 %v418_v36  ;;  %1045 = vmatpush.msrb.mxu3 %v435_v37  ;;  %v451_v35 = vld [vmem:[#allocation2 + $0xc70] sm:$0xff]  ;;  %v468_v36 = vld [vmem:[#allocation2 + $0xcf8] sm:$0xff] }
  0xbd   :  { %987 = vmatpush.msrb.mxu0 %v385_v38  ;;  %1006 = vmatpush.msrb.mxu1 %v402_v32  ;;  %v483_v37 = vld [vmem:[#allocation2 + $0xd70] sm:$0xff]  ;;  %v500_v38 = vld [vmem:[#allocation2 + $0xdf8] sm:$0xff]  ;;  %v450_v32 = vld [vmem:[#allocation2 + $0xc68] sm:$0xff] }
  0xbe   :  { %1027 = vmatpush.msrb.mxu2 %v417_v28  ;;  %1046 = vmatpush.msrb.mxu3 %v434_v39  ;;  %v467_v28 = vld [vmem:[#allocation2 + $0xcf0] sm:$0xff]  ;;  %v482_v39 = vld [vmem:[#allocation2 + $0xd68] sm:$0xff] }
  0xbf   :  { %988 = vmatpush.msrb.mxu0 %v384_v40  ;;  %1007 = vmatpush.msrb.mxu1 %v401_v41  ;;  %v499_v40 = vld [vmem:[#allocation2 + $0xdf0] sm:$0xff] }
  0xc0   :  { %1028 = vmatpush.msrb.mxu2 %v416_v42  ;;  %1047 = vmatpush.msrb.mxu3 %v433_v43  ;;  %v52_v41 = vld [vmem:[%s1384_s0 + $0x38] sm:$0x3]  ;;  %v449_v42 = vld [vmem:[#allocation2 + $0xc60] sm:$0xff]  ;;  %v466_v43 = vld [vmem:[#allocation2 + $0xce8] sm:$0xff]  ;;  %s1288_s0 = smov [#allocation7]  }
  0xc1   :  { %989 = vmatpush.msrb.mxu0 %v383_v44  ;;  %1008 = vmatpush.msrb.mxu1 %v400_v45  ;;  %547 = vst [vmem:[#allocation1 + $0x20] ss:$4 sm:$0xff] %v52_v41  ;;  %v481_v44 = vld [vmem:[#allocation2 + $0xd60] sm:$0xff]  ;;  %v498_v45 = vld [vmem:[#allocation2 + $0xde8] sm:$0xff]  ;;  %s1182_s11 = sshll.u32 %s1288_s0, 4  ;;  %s1183_s11 = int_to_ptr.vmem [resolvable:$true] %s1182_s11 }
  0xc2   :  { %1029 = vmatpush.msrb.mxu2 %v415_v46  ;;  %1048 = vmatpush.msrb.mxu3 %v432_v47  ;;  %v448_v46 = vld [vmem:[#allocation2 + $0xc58] sm:$0xff]  ;;  %v465_v47 = vld [vmem:[#allocation2 + $0xce0] sm:$0xff] }
  0xc3   :  { %990 = vmatpush.msrb.mxu0 %v382_v48  ;;  %1009 = vmatpush.msrb.mxu1 %v399_v49  ;;  %v480_v48 = vld [vmem:[#allocation2 + $0xd58] sm:$0xff]  ;;  %v497_v49 = vld [vmem:[#allocation2 + $0xde0] sm:$0xff] }
  0xc4   :  { %1030 = vmatpush.msrb.mxu2 %v414_v50  ;;  %1049 = vmatpush.msrb.mxu3 %v431_v51  ;;  %v447_v50 = vld [vmem:[#allocation2 + $0xc50] sm:$0xff]  ;;  %v464_v51 = vld [vmem:[#allocation2 + $0xcd8] sm:$0xff] }
  0xc5   :  { %991 = vmatpush.msrb.mxu0 %v381_v52  ;;  %1010 = vmatpush.msrb.mxu1 %v398_v53  ;;  %v479_v52 = vld [vmem:[#allocation2 + $0xd50] sm:$0xff]  ;;  %v496_v53 = vld [vmem:[#allocation2 + $0xdd8] sm:$0xff] }
  0xc6   :  { %1031 = vmatpush.msrb.mxu2 %v413_v54  ;;  %1050 = vmatpush.msrb.mxu3 %v430_v55  ;;  %v446_v54 = vld [vmem:[#allocation2 + $0xc48] sm:$0xff]  ;;  %v463_v55 = vld [vmem:[#allocation2 + $0xcd0] sm:$0xff] }
  0xc7   :  { %992 = vmatpush.msrb.mxu0 %v380_v56  ;;  %1011 = vmatpush.msrb.mxu1 %v397_v57  ;;  %v478_v56 = vld [vmem:[#allocation2 + $0xd48] sm:$0xff]  ;;  %v495_v57 = vld [vmem:[#allocation2 + $0xdd0] sm:$0xff] }
  0xc8   :  { %1032 = vmatpush.msrb.mxu2 %v412_v58  ;;  %1051 = vmatpush.msrb.mxu3 %v429_v59  ;;  %v445_v58 = vld [vmem:[#allocation2 + $0xc40] sm:$0xff]  ;;  %v462_v59 = vld [vmem:[#allocation2 + $0xcc8] sm:$0xff] }
  0xc9   :  { %993 = vmatpush.msrb.mxu0 %v379_v60  ;;  %1012 = vmatpush.msrb.mxu1 %v396_v61  ;;  %v477_v60 = vld [vmem:[#allocation2 + $0xd40] sm:$0xff]  ;;  %v494_v61 = vld [vmem:[#allocation2 + $0xdc8] sm:$0xff] }
  0xca   :  { %1033 = vmatpush.msrb.mxu2 %v411_v62  ;;  %1052 = vmatpush.msrb.mxu3 %v428_v63  ;;  %v444_v62 = vld [vmem:[#allocation2 + $0xc38] sm:$0xff]  ;;  %v461_v63 = vld [vmem:[#allocation2 + $0xcc0] sm:$0xff] }
  0xcb   :  { %994 = vmatpush.msrb.mxu0 %v378_v0  ;;  %1013 = vmatpush.msrb.mxu1 %v395_v1  ;;  %v476_v0 = vld [vmem:[#allocation2 + $0xd38] sm:$0xff]  ;;  %v493_v1 = vld [vmem:[#allocation2 + $0xdc0] sm:$0xff] }
  0xcc   :  { %1034 = vmatpush.msrb.mxu2 %v410_v2  ;;  %1053 = vmatpush.msrb.mxu3 %v427_v3  ;;  %v443_v2 = vld [vmem:[#allocation2 + $0xc30] sm:$0xff]  ;;  %v460_v3 = vld [vmem:[#allocation2 + $0xcb8] sm:$0xff] }
  0xcd   :  { %995 = vmatpush.msrb.mxu0 %v377_v4  ;;  %1014 = vmatpush.msrb.mxu1 %v394_v5  ;;  %v475_v4 = vld [vmem:[#allocation2 + $0xd30] sm:$0xff]  ;;  %v492_v5 = vld [vmem:[#allocation2 + $0xdb8] sm:$0xff] }
  0xce   :  { %1035 = vmatpush.msrb.mxu2 %v409_v6  ;;  %1054 = vmatpush.msrb.mxu3 %v426_v7  ;;  %v442_v6 = vld [vmem:[#allocation2 + $0xc28] sm:$0xff]  ;;  %v459_v7 = vld [vmem:[#allocation2 + $0xcb0] sm:$0xff] }
  0xcf   :  { %996 = vmatpush.msrb.mxu0 %v376_v8  ;;  %1015 = vmatpush.msrb.mxu1 %v393_v9  ;;  %v474_v8 = vld [vmem:[#allocation2 + $0xd28] sm:$0xff]  ;;  %v491_v9 = vld [vmem:[#allocation2 + $0xdb0] sm:$0xff] }
  0xd0   :  { %1036 = vmatpush.msrb.mxu2 %v408_v10  ;;  %1055 = vmatpush.msrb.mxu3 %v425_v11  ;;  %v441_v10 = vld [vmem:[#allocation2 + $0xc20] sm:$0xff]  ;;  %v458_v11 = vld [vmem:[#allocation2 + $0xca8] sm:$0xff] }
  0xd1   :  { %997 = vmatpush.msrb.mxu0 %v375_v12  ;;  %1016 = vmatpush.msrb.mxu1 %v392_v13  ;;  %v473_v12 = vld [vmem:[#allocation2 + $0xd20] sm:$0xff]  ;;  %v490_v13 = vld [vmem:[#allocation2 + $0xda8] sm:$0xff] }
  0xd2   :  { %1037 = vmatpush.msrb.mxu2 %v407_v14  ;;  %1056 = vmatpush.msrb.mxu3 %v424_v15  ;;  %v440_v14 = vld [vmem:[#allocation2 + $0xc18] sm:$0xff]  ;;  %v457_v15 = vld [vmem:[#allocation2 + $0xca0] sm:$0xff] }
  0xd3   :  { %998 = vmatpush.msrb.mxu0 %v374_v16  ;;  %1017 = vmatpush.msrb.mxu1 %v391_v17  ;;  %v472_v16 = vld [vmem:[#allocation2 + $0xd18] sm:$0xff]  ;;  %v489_v17 = vld [vmem:[#allocation2 + $0xda0] sm:$0xff] }
  0xd4   :  { %1038 = vmatpush.msrb.mxu2 %v406_v19  ;;  %1057 = vmatpush.msrb.mxu3 %v423_v20  ;;  %v456_v19 = vld [vmem:[#allocation2 + $0xc98] sm:$0xff]  ;;  %v471_v20 = vld [vmem:[#allocation2 + $0xd10] sm:$0xff] }
  0xd5   :  { %999 = vmatpush.msrb.mxu0 %v373_v21  ;;  %1018 = vmatpush.msrb.mxu1 %v390_v22  ;;  %v488_v21 = vld [vmem:[#allocation2 + $0xd98] sm:$0xff]  ;;  %v438_v22 = vld [vmem:[#allocation2 + $0xc08] sm:$0xff] }
  0xd6   :  { %1039 = vmatpush.msrb.mxu2 %v405_v23  ;;  %1058 = vmatpush.msrb.mxu3 %v422_v24  ;;  %v455_v23 = vld [vmem:[#allocation2 + $0xc90] sm:$0xff]  ;;  %v470_v24 = vld [vmem:[#allocation2 + $0xd08] sm:$0xff] }
  0xd7   :  { %1000 = vmatmul.f32.vlgmr.msrb.gmra.mxu0 %v542_v25  ;;  %1040 = vmatmul.f32.vlgmr.msrb.gmra.mxu2 %v544_v29  ;;  %v487_v25 = vld [vmem:[#allocation2 + $0xd90] sm:$0xff]  ;;  %v437_v29 = vld [vmem:[#allocation2 + $0xc00] sm:$0xff] }
  0xd8   :  { %1064 = vmatpush.msra.mxu0 %v452_v30  ;;  %1104 = vmatpush.msra.mxu2 %v484_v33  ;;  %v454_v30 = vld [vmem:[#allocation2 + $0xc88] sm:$0xff]  ;;  %v469_v33 = vld [vmem:[#allocation2 + $0xd00] sm:$0xff] }
  0xd9   :  { %1019 = vmatpush.msrb.mxu1 %v389_v34  ;;  %1059 = vmatpush.msrb.mxu3 %v421_v31  ;;  %v486_v34 = vld [vmem:[#allocation2 + $0xd88] sm:$0xff]  ;;  %v548_v31 = vld.sshfl [vmem:[#allocation1] sm:$0xff pattern:$0x73625140] }
  0xda   :  { %1020 = vmatmul.f32.vlgmr.msrb.gmra.mxu1 %v543_v26  ;;  %1060 = vmatmul.f32.vlgmr.msrb.gmra.mxu3 %v545_v27  ;;  %v550_v26 = vld.sshfl [vmem:[#allocation1 + $0x10] sm:$0xff pattern:$0x73625140]  ;;  %v453_v27 = vld [vmem:[#allocation2 + $0xc80] sm:$0xff] }
  0xdb   :  { %1065 = vmatpush.msra.mxu0 %v451_v35  ;;  %1084 = vmatpush.msra.mxu1 %v468_v36  ;;  %v485_v35 = vld [vmem:[#allocation2 + $0xd80] sm:$0xff] }
  0xdc   :  { %1105 = vmatpush.msra.mxu2 %v483_v37  ;;  %1124 = vmatpush.msra.mxu3 %v500_v38  ;;  %v549_v36 = vld.sshfl [vmem:[#allocation1 + $0x8] sm:$0xff pattern:$0x73625140]  ;;  %v551_v37 = vld.sshfl [vmem:[#allocation1 + $0x18] sm:$0xff pattern:$0x73625140] }
  0xdd   :  { %1066 = vmatpush.msra.mxu0 %v450_v32  ;;  %1085 = vmatpush.msra.mxu1 %v467_v28  ;;  %v502_v38 = vld [vmem:[#allocation2 + $0xe08] sm:$0xff]  ;;  %v501_v32 = vld [vmem:[#allocation2 + $0xe00] sm:$0xff]  ;;  %v552_v28 = vld.sshfl [vmem:[#allocation1 + $0x20] sm:$0xff pattern:$0x73625140] }
  0xde   :  { %1106 = vmatpush.msra.mxu2 %v482_v39  ;;  %1125 = vmatpush.msra.mxu3 %v499_v40  ;;  %v1201_v39 = vld [vmem:[#allocation5] ss:$0 sm:$0xff]  ;;  %v601_v40 = vpop.f32.mrf.mxu0 }
  0xdf   :  { %1067 = vmatpush.msra.mxu0 %v449_v42  ;;  %1086 = vmatpush.msra.mxu1 %v466_v43  ;;  %v602_v41 = vadd.f32 %v1201_v39, %v601_v40  ;;  %v621_v42 = vpop.f32.mrf.mxu1 }
  0xe0   :  { %1107 = vmatpush.msra.mxu2 %v481_v44  ;;  %1126 = vmatpush.msra.mxu3 %v498_v45  ;;  %v641_v44 = vpop.f32.mrf.mxu2 }
  0xe1   :  { %1068 = vmatpush.msra.mxu0 %v448_v46  ;;  %1087 = vmatpush.msra.mxu1 %v465_v47  ;;  %v622_v43 = vadd.f32 %v621_v42, %v602_v41  ;;  %v661_v46 = vpop.f32.mrf.mxu3 }
  0xe2   :  { %1108 = vmatpush.msra.mxu2 %v480_v48  ;;  %1127 = vmatpush.msra.mxu3 %v497_v49 }
  0xe3   :  { %1069 = vmatpush.msra.mxu0 %v447_v50  ;;  %1088 = vmatpush.msra.mxu1 %v464_v51  ;;  %v642_v45 = vadd.f32 %v641_v44, %v622_v43 }
  0xe4   :  { %1109 = vmatpush.msra.mxu2 %v479_v52  ;;  %1128 = vmatpush.msra.mxu3 %v496_v53 }
  0xe5   :  { %1070 = vmatpush.msra.mxu0 %v446_v54  ;;  %1089 = vmatpush.msra.mxu1 %v463_v55  ;;  %v662_v47 = vadd.f32 %v661_v46, %v642_v45 }
  0xe6   :  { %1110 = vmatpush.msra.mxu2 %v478_v56  ;;  %1129 = vmatpush.msra.mxu3 %v495_v57  ;;  %v681_v48 = vpop.f32.mrf.mxu0 }
  0xe7   :  { %1071 = vmatpush.msra.mxu0 %v445_v58  ;;  %1090 = vmatpush.msra.mxu1 %v462_v59  ;;  %v682_v49 = vadd.f32 %v681_v48, %v662_v47  ;;  %v701_v50 = vpop.f32.mrf.mxu1 }
  0xe8   :  { %1111 = vmatpush.msra.mxu2 %v477_v60  ;;  %1130 = vmatpush.msra.mxu3 %v494_v61  ;;  %v721_v52 = vpop.f32.mrf.mxu2 }
  0xe9   :  { %1072 = vmatpush.msra.mxu0 %v444_v62  ;;  %1091 = vmatpush.msra.mxu1 %v461_v63  ;;  %v702_v51 = vadd.f32 %v701_v50, %v682_v49  ;;  %v741_v54 = vpop.f32.mrf.mxu3 }
  0xea   :  { %1112 = vmatpush.msra.mxu2 %v476_v0  ;;  %1131 = vmatpush.msra.mxu3 %v493_v1 }
  0xeb   :  { %1073 = vmatpush.msra.mxu0 %v443_v2  ;;  %1092 = vmatpush.msra.mxu1 %v460_v3  ;;  %v722_v53 = vadd.f32 %v721_v52, %v702_v51 }
  0xec   :  { %1113 = vmatpush.msra.mxu2 %v475_v4  ;;  %1132 = vmatpush.msra.mxu3 %v492_v5 }
  0xed   :  { %1074 = vmatpush.msra.mxu0 %v442_v6  ;;  %1093 = vmatpush.msra.mxu1 %v459_v7  ;;  %v742_v56 = vadd.f32 %v741_v54, %v722_v53 }
  0xee   :  { %1114 = vmatpush.msra.mxu2 %v474_v8  ;;  %1133 = vmatpush.msra.mxu3 %v491_v9  ;;  %v761_v55 = vpop.f32.mrf.mxu0 }
  0xef   :  { %1075 = vmatpush.msra.mxu0 %v441_v10  ;;  %1094 = vmatpush.msra.mxu1 %v458_v11  ;;  %v762_v57 = vadd.f32 %v761_v55, %v742_v56 }
  0xf0   :  { %1115 = vmatpush.msra.mxu2 %v473_v12  ;;  %1134 = vmatpush.msra.mxu3 %v490_v13 }
  0xf1   :  { %1076 = vmatpush.msra.mxu0 %v440_v14  ;;  %1095 = vmatpush.msra.mxu1 %v457_v15  ;;  %v781_v58 = vpop.f32.mrf.mxu1 }
  0xf2   :  { %1116 = vmatpush.msra.mxu2 %v472_v16  ;;  %1135 = vmatpush.msra.mxu3 %v489_v17  ;;  %v782_v60 = vadd.f32 %v781_v58, %v762_v57 }
  0xf3   :  { %1077 = vmatpush.msra.mxu0 %v439_v18  ;;  %1096 = vmatpush.msra.mxu1 %v456_v19 }
  0xf4   :  { %1117 = vmatpush.msra.mxu2 %v471_v20  ;;  %1136 = vmatpush.msra.mxu3 %v488_v21  ;;  %v801_v59 = vpop.f32.mrf.mxu2 }
  0xf5   :  { %1078 = vmatpush.msra.mxu0 %v438_v22  ;;  %1097 = vmatpush.msra.mxu1 %v455_v23  ;;  %v802_v61 = vadd.f32 %v801_v59, %v782_v60 }
  0xf6   :  { %1118 = vmatpush.msra.mxu2 %v470_v24  ;;  %1137 = vmatpush.msra.mxu3 %v487_v25 }
  0xf7   :  { %1079 = vmatpush.msra.mxu0 %v437_v29  ;;  %1098 = vmatpush.msra.mxu1 %v454_v30  ;;  %v821_v62 = vpop.f32.mrf.mxu3 }
  0xf8   :  { %1119 = vmatpush.msra.mxu2 %v469_v33  ;;  %1138 = vmatpush.msra.mxu3 %v486_v34  ;;  %v822_v0 = vadd.f32 %v821_v62, %v802_v61 }
  0xf9   :  { %1080 = vmatmul.f32.vlgmr.msra.gmra.mxu0 %v548_v31  ;;  %1120 = vmatmul.f32.vlgmr.msra.gmra.mxu2 %v550_v26 }
  0xfa   :  { %1099 = vmatpush.msra.mxu1 %v453_v27  ;;  %1139 = vmatpush.msra.mxu3 %v485_v35 }
  0xfb   :  { %1100 = vmatmul.f32.vlgmr.msra.gmra.mxu1 %v549_v36  ;;  %1140 = vmatmul.f32.vlgmr.msra.gmra.mxu3 %v551_v37 }
  0xfc   :  { %1158 = vmatpush.msrb.mxu0 %v502_v38 }
  0xfe   :  { %1159 = vmatpush.msrb.mxu0 %v501_v32 }
 0x101   :  { %1195 = vmatmul.msk.f32.vlgmr.msrb.gmra.mxu0 %vm581_vm0, %v552_v28 }
 0x110   :  { %v841_v63 = vpop.f32.mrf.mxu0 }
 0x111   :  { %v842_v1 = vadd.f32 %v841_v63, %v822_v0 }
 0x113   :  { %v861_v2 = vpop.f32.mrf.mxu1 }
 0x114   :  { %v862_v4 = vadd.f32 %v861_v2, %v842_v1 }
 0x116   :  { %v881_v3 = vpop.f32.mrf.mxu2 }
 0x117   :  { %v882_v5 = vadd.f32 %v881_v3, %v862_v4 }
 0x119   :  { %v901_v6 = vpop.f32.mrf.mxu3 }
 0x11a   :  { %v902_v8 = vadd.f32 %v901_v6, %v882_v5 }
 0x132   :  { %v921_v7 = vpop.f32.mrf.mxu0 }
 0x133   :  { %v922_v9 = vadd.f32 %v921_v7, %v902_v8 }
 0x135   :  { %v941_v10 = vpop.f32.mrf.mxu1 }
 0x136   :  { %v942_v12 = vadd.f32 %v941_v10, %v922_v9 }
 0x138   :  { %v961_v11 = vpop.f32.mrf.mxu2 }
 0x139   :  { %v962_v13 = vadd.f32 %v961_v11, %v942_v12 }
 0x13b   :  { %v981_v14 = vpop.f32.mrf.mxu3 }
 0x13c   :  { %v982_v16 = vadd.f32 %v981_v14, %v962_v13 }
 0x154   :  { %v1001_v15 = vpop.f32.mrf.mxu0 }
 0x155   :  { %v1002_v17 = vadd.f32 %v1001_v15, %v982_v16 }
 0x157   :  { %v1021_v18 = vpop.f32.mrf.mxu1 }
 0x158   :  { %v1022_v20 = vadd.f32 %v1021_v18, %v1002_v17 }
 0x15a   :  { %v1041_v19 = vpop.f32.mrf.mxu2 }
 0x15b   :  { %v1042_v21 = vadd.f32 %v1041_v19, %v1022_v20 }
 0x15d   :  { %v1061_v22 = vpop.f32.mrf.mxu3 }
 0x15e   :  { %v1062_v23 = vadd.f32 %v1061_v22, %v1042_v21 }
 0x176   :  { %v1081_v24 = vpop.f32.mrf.mxu0 }
 0x177   :  { %v1082_v25 = vadd.f32 %v1081_v24, %v1062_v23 }
 0x178   :  { %v1101_v29 = vpop.f32.mrf.mxu1 }
 0x179   :  { %v1102_v30 = vadd.f32 %v1101_v29, %v1082_v25 }
 0x17c   :  { %v1121_v33 = vpop.f32.mrf.mxu2 }
 0x17d   :  { %v1122_v34 = vadd.f32 %v1121_v33, %v1102_v30 }
 0x17e   :  { %v1141_v31 = vpop.f32.mrf.mxu3  ;;  %v1161_v26 = vpop.f32.mrf.mxu0 }
 0x17f   :  { %v1142_v27 = vadd.f32 %v1141_v31, %v1122_v34 }
 0x181   :  { %v1162_v35 = vadd.f32 %v1161_v26, %v1142_v27 }
 0x183   :  { %v1165_v36 = vsel %vm1164_vm1, %v1162_v35, -inf }
 0x184   :  { %1166 = vmax.xlane.f32.xlu0 %v1165_v36 }
 0x1f7   :  { %v1167_v37 = vpop.xlane.xlu0 %1166 }
 0x1f8   :  { %v1168_v38 = vsub.f32 %v1162_v35, %v1167_v37 }
 0x1fa   :  { %v1169_v32 = vmul.f32 1.442695, %v1168_v38 }
 0x1fc   :  { %1202 = vpow2.f32 %v1169_v32 }
 0x202   :  { %v1203_v28 = vpop.eup %1202 }
 0x203   :  { %v1171_v39 = vsel %vm1164_vm1, %v1203_v28, 0.0 }
 0x204   :  { %1172 = vadd.xlane.f32.xlu0 %v1171_v39 }
 0x277   :  { %v1173_v40 = vpop.xlane.xlu0 %1172 }
 0x278   :  { %1204 = vrcp.f32 %v1173_v40 }
 0x27e   :  { %v1205_v41 = vpop.eup %1204 }
 0x27f   :  { %v1175_v42 = vmul.f32 %v1205_v41, %v1203_v28 }
 0x281   :  { %1176 = vst [vmem:[#allocation7] sm:$0x3] %v1175_v42 }
 0x282   :  { %1187 = dma.vmem_to_hbm [thread:$0]  %s1183_s11, 32, %s1185_s14, [#allocation4]  }
 0x283   :  { %1282 = dma.done.wait [#allocation4], 32  }
 0x284   :  { %1283 = vsyncadd [#allocation4], 4294967264 }
 0x285   :  { %1192 = vsyncpa [#allocation3], 1 }
 0x286   :  { %1193 = vsyncpa [#allocation6], 1 }
 0x287   :  { %1194 = vsyncpa [#allocation4], 1 }

</bundles_post_ra>
